<compile_context>
chip_gen: v5e
topology: v5e:2x2
jax: 0.10.0
libtpu: 0.0.40
codegen_flags: <defaults>
</compile_context>

<pallas_src>
import functools

import jax
import jax.numpy as jnp
from jax.experimental import pallas as pl
from jax.experimental.pallas import tpu as pltpu

COMPUTE_DTYPE = jnp.bfloat16  # MXU operand dtype (accumulation stays f32)


# ----------------------------------------------------------------------------
# In-kernel helpers
# ----------------------------------------------------------------------------

def _im2col(x, K):
    """x: (Bt, L, C) bf16 -> (Bt*L, K*C) 'same'-padded im2col slab (bf16).

    Single-pass, fully vectorized over the batch tile: pad once along time,
    build the K shifted views with one concat along channels, one reshape.
    Padding: left = (K-1)//2, right = K//2 (PyTorch Conv1dSamePadding, stride=1).
    """
    Bt, L, C = x.shape
    if K == 1:
        return x.reshape(Bt * L, C)
    left, right = (K - 1) // 2, K // 2
    xp = jnp.concatenate(
        [jnp.zeros((Bt, left, C), x.dtype), x, jnp.zeros((Bt, right, C), x.dtype)],
        axis=1)                                                  # (Bt, L+K-1, C)
    cols = jnp.concatenate([xp[:, k:k + L, :] for k in range(K)], axis=-1)
    return cols.reshape(Bt * L, K * C)                           # (Bt*L, K*C)


def _resnet_kernel(x_ref, *refs, ks, has_res):
    """Fully fused ResNet forward for one batch tile.

    x_ref : (Bt, L, Cin) f32 activations.
    refs  : per block [w1,b1,w2,b2,w3,b3,(wr,br)] , then wfc,bfc , then o_ref.
            Weights are bf16 with BN folded in; biases are f32 (1, Cout).
    """
    refs = list(refs)
    idx = 0
    blocks = []
    for hr in has_res:
        w1, b1, w2, b2, w3, b3 = refs[idx:idx + 6]
        idx += 6
        if hr:
            wr, br = refs[idx:idx + 2]
            idx += 2
        else:
            wr = br = None
        blocks.append((w1, b1, w2, b2, w3, b3, wr, br))
    wfc_ref, bfc_ref = refs[idx], refs[idx + 1]
    o_ref = refs[idx + 2]

    Bt, L, _ = x_ref.shape
    h = x_ref[...].astype(COMPUTE_DTYPE)                         # (Bt, L, Cin) bf16

    def conv_bn_relu(h_bf, w_ref, b_ref, K):
        cols = _im2col(h_bf, K)                                  # bf16 (Bt*L, K*C)
        y = jnp.dot(cols, w_ref[...], preferred_element_type=jnp.float32)
        return jnp.maximum(y + b_ref[...], 0.0)                  # f32 (Bt*L, Cout)

    h_f32 = None
    for (w1, b1, w2, b2, w3, b3, wr, br) in blocks:
        x_in = h                                                 # bf16 block input
        cin = x_in.shape[-1]
        y = conv_bn_relu(x_in, w1, b1, ks[0])
        y = conv_bn_relu(y.astype(COMPUTE_DTYPE).reshape(Bt, L, -1), w2, b2, ks[1])
        y = conv_bn_relu(y.astype(COMPUTE_DTYPE).reshape(Bt, L, -1), w3, b3, ks[2])
        if wr is not None:
            # 1x1 conv + folded BN on the block input; no ReLU after the addition.
            r = jnp.dot(x_in.reshape(Bt * L, cin), wr[...],
                        preferred_element_type=jnp.float32) + br[...]
            y = y + r
        h_f32 = y.reshape(Bt, L, -1)                             # f32 (Bt, L, Cout)
        h = h_f32.astype(COMPUTE_DTYPE)                          # bf16 for next block

    # Fused head: global average pool over time (XLU reduction) + Linear.
    g = jnp.mean(h_f32, axis=1)                                  # f32 (Bt, C)
    logits = jnp.dot(g.astype(COMPUTE_DTYPE), wfc_ref[...],
                     preferred_element_type=jnp.float32) + bfc_ref[...]
    o_ref[...] = logits[:, None, :].astype(o_ref.dtype)          # (Bt, 1, ncls)


# ----------------------------------------------------------------------------
# Wrapper
# ----------------------------------------------------------------------------

def _choose_batch_tile(N, L, *, max_rows=2048):
    """Largest divisor Bt of N with grid >= min(N, 4) steps and Bt*L <= max_rows."""
    min_grid = min(N, 4)
    best = 1
    for bt in range(1, N + 1):
        if N % bt:
            continue
        if N // bt < min_grid:
            continue
        if bt * L > max_rows:
            continue
        best = max(best, bt)
    return best


def _vmem_limit_bytes(Bt, L, Cin, params):
    """Conservative scoped-VMEM budget for one grid step, clamped for v7x."""
    blocks = params["blocks"]
    wfc, bfc = params["fc"]
    M = Bt * L
    max_c = max(int(b["b3"].shape[-1]) for b in blocks)
    slab_cols = max(int(b[w].shape[0]) for b in blocks for w in ("w1", "w2", "w3"))
    weight_bytes = sum(int(v.size) * v.dtype.itemsize
                       for b in blocks for k, v in b.items()
                       if k != "ks" and v is not None)
    weight_bytes += int(wfc.size) * wfc.dtype.itemsize + int(bfc.size) * bfc.dtype.itemsize
    ncls = int(wfc.shape[-1])
    est = (2 * Bt * L * Cin * 4              # double-buffered input tile (f32)
           + 2 * Bt * max(ncls, 128) * 4     # double-buffered (lane-padded) output
           + 2 * weight_bytes                # weights (double-buffer worst case)
           + M * slab_cols * 2               # largest bf16 im2col slab
           + 3 * M * max_c * 4               # f32 conv out / residual / GAP source
           + 2 * M * max_c * 2)              # bf16 inter-conv activations
    # Raise above the per-chip scoped defaults (16/32 MiB) but stay well under
    # v7x's 64 MiB physical VMEM.
    return int(min(max(2 * est, 32 << 20), 48 << 20))


def resnet_forward(x_nlc, params, *, batch_tile=None):
    """x_nlc: (N, L, C_in) f32 -> logits (N, num_pred_classes) f32."""
    N, L, Cin = x_nlc.shape
    blocks = params["blocks"]
    wfc, bfc = params["fc"]
    ncls = int(wfc.shape[-1])
    ks = blocks[0]["ks"]

    Bt = _choose_batch_tile(N, L) if batch_tile is None else batch_tile
    assert N % Bt == 0, "batch tile must divide batch"
    grid = (N // Bt,)

    operands = [x_nlc]
    in_specs = [pl.BlockSpec((Bt, L, Cin), lambda n: (n, 0, 0))]
    has_res = []
    for blk in blocks:
        for name in ("w1", "b1", "w2", "b2", "w3", "b3"):
            operands.append(blk[name])
        hr = blk.get("wr") is not None
        has_res.append(hr)
        if hr:
            operands += [blk["wr"], blk["br"]]
    operands += [wfc, bfc]
    for op in operands[1:]:                                  # resident weights/biases
        in_specs.append(pl.BlockSpec(op.shape, lambda n, _nd=op.ndim: (0,) * _nd))

    out_shape = jax.ShapeDtypeStruct((N, 1, ncls), jnp.float32)
    out_spec = pl.BlockSpec((Bt, 1, ncls), lambda n: (n, 0, 0))

    out = pl.pallas_call(
        functools.partial(_resnet_kernel, ks=ks, has_res=tuple(has_res)),
        out_shape=out_shape,
        grid=grid,
        in_specs=in_specs,
        out_specs=out_spec,
        compiler_params=pltpu.CompilerParams(
            dimension_semantics=("parallel",),
            vmem_limit_bytes=_vmem_limit_bytes(Bt, L, Cin, params)),
    )(*operands)
    return out.reshape(N, ncls)


# ----------------------------------------------------------------------------
# Deterministic parameter initialization + inference-mode BN folding
# ----------------------------------------------------------------------------

def _init_conv(key, K, cin, cout):
    k1, k2 = jax.random.split(key)
    bound = 1.0 / (cin * K) ** 0.5
    w = jax.random.uniform(k1, (K, cin, cout), jnp.float32, -bound, bound)
    b = jax.random.uniform(k2, (cout,), jnp.float32, -bound, bound)
    return w, b


def _init_linear(key, cin, cout):
    k1, k2 = jax.random.split(key)
    bound = 1.0 / cin ** 0.5
    w = jax.random.uniform(k1, (cin, cout), jnp.float32, -bound, bound)
    b = jax.random.uniform(k2, (cout,), jnp.float32, -bound, bound)
    return w, b


def _init_bn(key, c):
    k1, k2 = jax.random.split(key)
    gamma = 1.0 + 0.1 * jax.random.normal(k1, (c,), jnp.float32)
    beta = 0.1 * jax.random.normal(k2, (c,), jnp.float32)
    mean = jnp.zeros((c,), jnp.float32)
    var = jnp.ones((c,), jnp.float32)
    return gamma, beta, mean, var


def _fold_conv_bn(conv, bn, eps=1e-5):
    """Fold eval-mode BatchNorm into the conv: w' = w*scale, b' = (b-mean)*scale+beta."""
    w, b = conv
    gamma, beta, mean, var = bn
    scale = gamma / jnp.sqrt(var + eps)                      # (Cout,)
    wf = (w * scale).reshape(-1, w.shape[-1])                # (K*Cin, Cout)
    bf = ((b - mean) * scale + beta).reshape(1, -1)          # (1, Cout), f32
    return wf.astype(COMPUTE_DTYPE), bf


def init_resnet(key, in_channels, mid_channels=64, num_pred_classes=1):
    cfg = [(in_channels, mid_channels),
           (mid_channels, mid_channels * 2),
           (mid_channels * 2, mid_channels * 2)]
    kss = (8, 5, 3)
    keys = iter(jax.random.split(key, 8 * len(cfg) + 2))

    blocks = []
    for cin, cout in cfg:
        chans = [cin, cout, cout, cout]
        blk = {"ks": kss}
        for j, K in enumerate(kss):
            conv = _init_conv(next(keys), K, chans[j], chans[j + 1])
            bn = _init_bn(next(keys), chans[j + 1])
            blk[f"w{j + 1}"], blk[f"b{j + 1}"] = _fold_conv_bn(conv, bn)
        if cin != cout:                      # ResNetBlock.match_channels
            conv = _init_conv(next(keys), 1, cin, cout)
            bn = _init_bn(next(keys), cout)
            blk["wr"], blk["br"] = _fold_conv_bn(conv, bn)
        else:
            blk["wr"] = blk["br"] = None
        blocks.append(blk)

    wfc, bfc = _init_linear(next(keys), mid_channels * 2, num_pred_classes)
    fc = (wfc.astype(COMPUTE_DTYPE), bfc.reshape(1, -1))
    return {"blocks": blocks, "fc": fc}


# ----------------------------------------------------------------------------

if __name__ == "__main__":
    key = jax.random.PRNGKey(0)
    kx, kp = jax.random.split(key)

    N, C_IN, L = 2, 4, 16
    MID, N_CLASSES = 64, 3

    # PyTorch-convention input (N, C, L); transpose once to the kernel NLC layout.
    x_ncl = jax.random.normal(kx, (N, C_IN, L), jnp.float32)
    x_nlc = jnp.transpose(x_ncl, (0, 2, 1))

    params = init_resnet(kp, C_IN, MID, N_CLASSES)

    fwd = jax.jit(lambda x: resnet_forward(x, params))
    out = jax.block_until_ready(fwd(x_nlc))

    assert out.shape == (N, N_CLASSES)
    assert bool(jnp.all(jnp.isfinite(out)))
    print("KERNEL_OK")
</pallas_src>

<mosaic_0001>
module attributes {stable_mosaic.version = 11 : i64} {
  func.func @_resnet_kernel(%arg0: i32, %arg1: memref<1x16x4xf32, #tpu.memory_space<vmem>>, %arg2: memref<32x64xbf16, #tpu.memory_space<vmem>>, %arg3: memref<1x64xf32, #tpu.memory_space<vmem>>, %arg4: memref<320x64xbf16, #tpu.memory_space<vmem>>, %arg5: memref<1x64xf32, #tpu.memory_space<vmem>>, %arg6: memref<192x64xbf16, #tpu.memory_space<vmem>>, %arg7: memref<1x64xf32, #tpu.memory_space<vmem>>, %arg8: memref<4x64xbf16, #tpu.memory_space<vmem>>, %arg9: memref<1x64xf32, #tpu.memory_space<vmem>>, %arg10: memref<512x128xbf16, #tpu.memory_space<vmem>>, %arg11: memref<1x128xf32, #tpu.memory_space<vmem>>, %arg12: memref<640x128xbf16, #tpu.memory_space<vmem>>, %arg13: memref<1x128xf32, #tpu.memory_space<vmem>>, %arg14: memref<384x128xbf16, #tpu.memory_space<vmem>>, %arg15: memref<1x128xf32, #tpu.memory_space<vmem>>, %arg16: memref<64x128xbf16, #tpu.memory_space<vmem>>, %arg17: memref<1x128xf32, #tpu.memory_space<vmem>>, %arg18: memref<1024x128xbf16, #tpu.memory_space<vmem>>, %arg19: memref<1x128xf32, #tpu.memory_space<vmem>>, %arg20: memref<640x128xbf16, #tpu.memory_space<vmem>>, %arg21: memref<1x128xf32, #tpu.memory_space<vmem>>, %arg22: memref<384x128xbf16, #tpu.memory_space<vmem>>, %arg23: memref<1x128xf32, #tpu.memory_space<vmem>>, %arg24: memref<128x3xbf16, #tpu.memory_space<vmem>>, %arg25: memref<1x3xf32, #tpu.memory_space<vmem>>, %arg26: memref<1x1x3xf32, #tpu.memory_space<vmem>>) attributes {dimension_semantics = [#tpu.dimension_semantics<parallel>], iteration_bounds = array<i64: 2>, scalar_prefetch = 0 : i64, scratch_operands = 0 : i64, tpu.core_type = #tpu.core_type<tc>, window_params = [{transform_indices = @transform_0, window_bounds = array<i64: 1, 16, 4>}, {pipeline_mode = #tpu.pipeline_mode<synchronous>, transform_indices = @transform_1, window_bounds = array<i64: 32, 64>}, {pipeline_mode = #tpu.pipeline_mode<synchronous>, transform_indices = @transform_2, window_bounds = array<i64: 1, 64>}, {pipeline_mode = #tpu.pipeline_mode<synchronous>, transform_indices = @transform_3, window_bounds = array<i64: 320, 64>}, {pipeline_mode = #tpu.pipeline_mode<synchronous>, transform_indices = @transform_4, window_bounds = array<i64: 1, 64>}, {pipeline_mode = #tpu.pipeline_mode<synchronous>, transform_indices = @transform_5, window_bounds = array<i64: 192, 64>}, {pipeline_mode = #tpu.pipeline_mode<synchronous>, transform_indices = @transform_6, window_bounds = array<i64: 1, 64>}, {pipeline_mode = #tpu.pipeline_mode<synchronous>, transform_indices = @transform_7, window_bounds = array<i64: 4, 64>}, {pipeline_mode = #tpu.pipeline_mode<synchronous>, transform_indices = @transform_8, window_bounds = array<i64: 1, 64>}, {pipeline_mode = #tpu.pipeline_mode<synchronous>, transform_indices = @transform_9, window_bounds = array<i64: 512, 128>}, {pipeline_mode = #tpu.pipeline_mode<synchronous>, transform_indices = @transform_10, window_bounds = array<i64: 1, 128>}, {pipeline_mode = #tpu.pipeline_mode<synchronous>, transform_indices = @transform_11, window_bounds = array<i64: 640, 128>}, {pipeline_mode = #tpu.pipeline_mode<synchronous>, transform_indices = @transform_12, window_bounds = array<i64: 1, 128>}, {pipeline_mode = #tpu.pipeline_mode<synchronous>, transform_indices = @transform_13, window_bounds = array<i64: 384, 128>}, {pipeline_mode = #tpu.pipeline_mode<synchronous>, transform_indices = @transform_14, window_bounds = array<i64: 1, 128>}, {pipeline_mode = #tpu.pipeline_mode<synchronous>, transform_indices = @transform_15, window_bounds = array<i64: 64, 128>}, {pipeline_mode = #tpu.pipeline_mode<synchronous>, transform_indices = @transform_16, window_bounds = array<i64: 1, 128>}, {pipeline_mode = #tpu.pipeline_mode<synchronous>, transform_indices = @transform_17, window_bounds = array<i64: 1024, 128>}, {pipeline_mode = #tpu.pipeline_mode<synchronous>, transform_indices = @transform_18, window_bounds = array<i64: 1, 128>}, {pipeline_mode = #tpu.pipeline_mode<synchronous>, transform_indices = @transform_19, window_bounds = array<i64: 640, 128>}, {pipeline_mode = #tpu.pipeline_mode<synchronous>, transform_indices = @transform_20, window_bounds = array<i64: 1, 128>}, {pipeline_mode = #tpu.pipeline_mode<synchronous>, transform_indices = @transform_21, window_bounds = array<i64: 384, 128>}, {pipeline_mode = #tpu.pipeline_mode<synchronous>, transform_indices = @transform_22, window_bounds = array<i64: 1, 128>}, {pipeline_mode = #tpu.pipeline_mode<synchronous>, transform_indices = @transform_23, window_bounds = array<i64: 128, 3>}, {pipeline_mode = #tpu.pipeline_mode<synchronous>, transform_indices = @transform_24, window_bounds = array<i64: 1, 3>}, {transform_indices = @transform_25, window_bounds = array<i64: 1, 1, 3>}]} {
    %c0 = arith.constant 0 : index
    %c0_0 = arith.constant 0 : index
    %c0_1 = arith.constant 0 : index
    %0 = vector.load %arg1[%c0, %c0_0, %c0_1] : memref<1x16x4xf32, #tpu.memory_space<vmem>>, vector<1x16x4xf32>
    %1 = arith.truncf %0 : vector<1x16x4xf32> to vector<1x16x4xbf16>
    %cst = arith.constant 0.000000e+00 : bf16
    %2 = vector.broadcast %cst : bf16 to vector<1x3x4xbf16>
    %cst_2 = arith.constant 0.000000e+00 : bf16
    %3 = vector.broadcast %cst_2 : bf16 to vector<1x4x4xbf16>
    %4 = tpu.concatenate %2, %1, %3 in 1 : vector<1x3x4xbf16>, vector<1x16x4xbf16>, vector<1x4x4xbf16> -> vector<1x23x4xbf16>
    %5 = vector.extract_strided_slice %4 {offsets = [0, 0, 0], sizes = [1, 16, 4], strides = [1, 1, 1]} : vector<1x23x4xbf16> to vector<1x16x4xbf16>
    %6 = vector.extract_strided_slice %4 {offsets = [0, 1, 0], sizes = [1, 16, 4], strides = [1, 1, 1]} : vector<1x23x4xbf16> to vector<1x16x4xbf16>
    %7 = vector.extract_strided_slice %4 {offsets = [0, 2, 0], sizes = [1, 16, 4], strides = [1, 1, 1]} : vector<1x23x4xbf16> to vector<1x16x4xbf16>
    %8 = vector.extract_strided_slice %4 {offsets = [0, 3, 0], sizes = [1, 16, 4], strides = [1, 1, 1]} : vector<1x23x4xbf16> to vector<1x16x4xbf16>
    %9 = vector.extract_strided_slice %4 {offsets = [0, 4, 0], sizes = [1, 16, 4], strides = [1, 1, 1]} : vector<1x23x4xbf16> to vector<1x16x4xbf16>
    %10 = vector.extract_strided_slice %4 {offsets = [0, 5, 0], sizes = [1, 16, 4], strides = [1, 1, 1]} : vector<1x23x4xbf16> to vector<1x16x4xbf16>
    %11 = vector.extract_strided_slice %4 {offsets = [0, 6, 0], sizes = [1, 16, 4], strides = [1, 1, 1]} : vector<1x23x4xbf16> to vector<1x16x4xbf16>
    %12 = vector.extract_strided_slice %4 {offsets = [0, 7, 0], sizes = [1, 16, 4], strides = [1, 1, 1]} : vector<1x23x4xbf16> to vector<1x16x4xbf16>
    %13 = tpu.concatenate %5, %6, %7, %8, %9, %10, %11, %12 in 2 : vector<1x16x4xbf16>, vector<1x16x4xbf16>, vector<1x16x4xbf16>, vector<1x16x4xbf16>, vector<1x16x4xbf16>, vector<1x16x4xbf16>, vector<1x16x4xbf16>, vector<1x16x4xbf16> -> vector<1x16x32xbf16>
    %14 = vector.shape_cast %13 : vector<1x16x32xbf16> to vector<16x32xbf16>
    %c0_3 = arith.constant 0 : index
    %c0_4 = arith.constant 0 : index
    %15 = vector.load %arg2[%c0_3, %c0_4] : memref<32x64xbf16, #tpu.memory_space<vmem>>, vector<32x64xbf16>
    %cst_5 = arith.constant dense<0.000000e+00> : vector<16x64xf32>
    %16 = tpu.matmul %14, %15, %cst_5 {dimension_numbers = #tpu.dot_dimension_numbers<[1], [0], [0], [1], [0, 0, 1, 1], [], []>} : vector<16x32xbf16>, vector<32x64xbf16>, vector<16x64xf32> -> vector<16x64xf32>
    %c0_6 = arith.constant 0 : index
    %c0_7 = arith.constant 0 : index
    %17 = vector.load %arg3[%c0_6, %c0_7] : memref<1x64xf32, #tpu.memory_space<vmem>>, vector<1x64xf32>
    %18 = vector.broadcast %17 : vector<1x64xf32> to vector<16x64xf32>
    %19 = arith.addf %16, %18 : vector<16x64xf32>
    %cst_8 = arith.constant 0.000000e+00 : f32
    %20 = vector.broadcast %cst_8 : f32 to vector<16x64xf32>
    %21 = arith.maximumf %19, %20 : vector<16x64xf32>
    %22 = arith.truncf %21 : vector<16x64xf32> to vector<16x64xbf16>
    %23 = vector.shape_cast %22 : vector<16x64xbf16> to vector<1x16x64xbf16>
    %cst_9 = arith.constant 0.000000e+00 : bf16
    %24 = vector.broadcast %cst_9 : bf16 to vector<1x2x64xbf16>
    %cst_10 = arith.constant 0.000000e+00 : bf16
    %25 = vector.broadcast %cst_10 : bf16 to vector<1x2x64xbf16>
    %26 = tpu.concatenate %24, %23, %25 in 1 : vector<1x2x64xbf16>, vector<1x16x64xbf16>, vector<1x2x64xbf16> -> vector<1x20x64xbf16>
    %27 = vector.extract_strided_slice %26 {offsets = [0, 0, 0], sizes = [1, 16, 64], strides = [1, 1, 1]} : vector<1x20x64xbf16> to vector<1x16x64xbf16>
    %28 = vector.extract_strided_slice %26 {offsets = [0, 1, 0], sizes = [1, 16, 64], strides = [1, 1, 1]} : vector<1x20x64xbf16> to vector<1x16x64xbf16>
    %29 = vector.extract_strided_slice %26 {offsets = [0, 2, 0], sizes = [1, 16, 64], strides = [1, 1, 1]} : vector<1x20x64xbf16> to vector<1x16x64xbf16>
    %30 = vector.extract_strided_slice %26 {offsets = [0, 3, 0], sizes = [1, 16, 64], strides = [1, 1, 1]} : vector<1x20x64xbf16> to vector<1x16x64xbf16>
    %31 = vector.extract_strided_slice %26 {offsets = [0, 4, 0], sizes = [1, 16, 64], strides = [1, 1, 1]} : vector<1x20x64xbf16> to vector<1x16x64xbf16>
    %32 = tpu.concatenate %27, %28, %29, %30, %31 in 2 : vector<1x16x64xbf16>, vector<1x16x64xbf16>, vector<1x16x64xbf16>, vector<1x16x64xbf16>, vector<1x16x64xbf16> -> vector<1x16x320xbf16>
    %33 = vector.shape_cast %32 : vector<1x16x320xbf16> to vector<16x320xbf16>
    %c0_11 = arith.constant 0 : index
    %c0_12 = arith.constant 0 : index
    %34 = vector.load %arg4[%c0_11, %c0_12] : memref<320x64xbf16, #tpu.memory_space<vmem>>, vector<320x64xbf16>
    %cst_13 = arith.constant dense<0.000000e+00> : vector<16x64xf32>
    %35 = tpu.matmul %33, %34, %cst_13 {dimension_numbers = #tpu.dot_dimension_numbers<[1], [0], [0], [1], [0, 0, 1, 1], [], []>} : vector<16x320xbf16>, vector<320x64xbf16>, vector<16x64xf32> -> vector<16x64xf32>
    %c0_14 = arith.constant 0 : index
    %c0_15 = arith.constant 0 : index
    %36 = vector.load %arg5[%c0_14, %c0_15] : memref<1x64xf32, #tpu.memory_space<vmem>>, vector<1x64xf32>
    %37 = vector.broadcast %36 : vector<1x64xf32> to vector<16x64xf32>
    %38 = arith.addf %35, %37 : vector<16x64xf32>
    %cst_16 = arith.constant 0.000000e+00 : f32
    %39 = vector.broadcast %cst_16 : f32 to vector<16x64xf32>
    %40 = arith.maximumf %38, %39 : vector<16x64xf32>
    %41 = arith.truncf %40 : vector<16x64xf32> to vector<16x64xbf16>
    %42 = vector.shape_cast %41 : vector<16x64xbf16> to vector<1x16x64xbf16>
    %cst_17 = arith.constant 0.000000e+00 : bf16
    %43 = vector.broadcast %cst_17 : bf16 to vector<1x1x64xbf16>
    %cst_18 = arith.constant 0.000000e+00 : bf16
    %44 = vector.broadcast %cst_18 : bf16 to vector<1x1x64xbf16>
    %45 = tpu.concatenate %43, %42, %44 in 1 : vector<1x1x64xbf16>, vector<1x16x64xbf16>, vector<1x1x64xbf16> -> vector<1x18x64xbf16>
    %46 = vector.extract_strided_slice %45 {offsets = [0, 0, 0], sizes = [1, 16, 64], strides = [1, 1, 1]} : vector<1x18x64xbf16> to vector<1x16x64xbf16>
    %47 = vector.extract_strided_slice %45 {offsets = [0, 1, 0], sizes = [1, 16, 64], strides = [1, 1, 1]} : vector<1x18x64xbf16> to vector<1x16x64xbf16>
    %48 = vector.extract_strided_slice %45 {offsets = [0, 2, 0], sizes = [1, 16, 64], strides = [1, 1, 1]} : vector<1x18x64xbf16> to vector<1x16x64xbf16>
    %49 = tpu.concatenate %46, %47, %48 in 2 : vector<1x16x64xbf16>, vector<1x16x64xbf16>, vector<1x16x64xbf16> -> vector<1x16x192xbf16>
    %50 = vector.shape_cast %49 : vector<1x16x192xbf16> to vector<16x192xbf16>
    %c0_19 = arith.constant 0 : index
    %c0_20 = arith.constant 0 : index
    %51 = vector.load %arg6[%c0_19, %c0_20] : memref<192x64xbf16, #tpu.memory_space<vmem>>, vector<192x64xbf16>
    %cst_21 = arith.constant dense<0.000000e+00> : vector<16x64xf32>
    %52 = tpu.matmul %50, %51, %cst_21 {dimension_numbers = #tpu.dot_dimension_numbers<[1], [0], [0], [1], [0, 0, 1, 1], [], []>} : vector<16x192xbf16>, vector<192x64xbf16>, vector<16x64xf32> -> vector<16x64xf32>
    %c0_22 = arith.constant 0 : index
    %c0_23 = arith.constant 0 : index
    %53 = vector.load %arg7[%c0_22, %c0_23] : memref<1x64xf32, #tpu.memory_space<vmem>>, vector<1x64xf32>
    %54 = vector.broadcast %53 : vector<1x64xf32> to vector<16x64xf32>
    %55 = arith.addf %52, %54 : vector<16x64xf32>
    %cst_24 = arith.constant 0.000000e+00 : f32
    %56 = vector.broadcast %cst_24 : f32 to vector<16x64xf32>
    %57 = arith.maximumf %55, %56 : vector<16x64xf32>
    %58 = vector.shape_cast %1 : vector<1x16x4xbf16> to vector<16x4xbf16>
    %c0_25 = arith.constant 0 : index
    %c0_26 = arith.constant 0 : index
    %59 = vector.load %arg8[%c0_25, %c0_26] : memref<4x64xbf16, #tpu.memory_space<vmem>>, vector<4x64xbf16>
    %cst_27 = arith.constant dense<0.000000e+00> : vector<16x64xf32>
    %60 = tpu.matmul %58, %59, %cst_27 {dimension_numbers = #tpu.dot_dimension_numbers<[1], [0], [0], [1], [0, 0, 1, 1], [], []>} : vector<16x4xbf16>, vector<4x64xbf16>, vector<16x64xf32> -> vector<16x64xf32>
    %c0_28 = arith.constant 0 : index
    %c0_29 = arith.constant 0 : index
    %61 = vector.load %arg9[%c0_28, %c0_29] : memref<1x64xf32, #tpu.memory_space<vmem>>, vector<1x64xf32>
    %62 = vector.broadcast %61 : vector<1x64xf32> to vector<16x64xf32>
    %63 = arith.addf %60, %62 : vector<16x64xf32>
    %64 = arith.addf %57, %63 : vector<16x64xf32>
    %65 = vector.shape_cast %64 : vector<16x64xf32> to vector<1x16x64xf32>
    %66 = arith.truncf %65 : vector<1x16x64xf32> to vector<1x16x64xbf16>
    %cst_30 = arith.constant 0.000000e+00 : bf16
    %67 = vector.broadcast %cst_30 : bf16 to vector<1x3x64xbf16>
    %cst_31 = arith.constant 0.000000e+00 : bf16
    %68 = vector.broadcast %cst_31 : bf16 to vector<1x4x64xbf16>
    %69 = tpu.concatenate %67, %66, %68 in 1 : vector<1x3x64xbf16>, vector<1x16x64xbf16>, vector<1x4x64xbf16> -> vector<1x23x64xbf16>
    %70 = vector.extract_strided_slice %69 {offsets = [0, 0, 0], sizes = [1, 16, 64], strides = [1, 1, 1]} : vector<1x23x64xbf16> to vector<1x16x64xbf16>
    %71 = vector.extract_strided_slice %69 {offsets = [0, 1, 0], sizes = [1, 16, 64], strides = [1, 1, 1]} : vector<1x23x64xbf16> to vector<1x16x64xbf16>
    %72 = vector.extract_strided_slice %69 {offsets = [0, 2, 0], sizes = [1, 16, 64], strides = [1, 1, 1]} : vector<1x23x64xbf16> to vector<1x16x64xbf16>
    %73 = vector.extract_strided_slice %69 {offsets = [0, 3, 0], sizes = [1, 16, 64], strides = [1, 1, 1]} : vector<1x23x64xbf16> to vector<1x16x64xbf16>
    %74 = vector.extract_strided_slice %69 {offsets = [0, 4, 0], sizes = [1, 16, 64], strides = [1, 1, 1]} : vector<1x23x64xbf16> to vector<1x16x64xbf16>
    %75 = vector.extract_strided_slice %69 {offsets = [0, 5, 0], sizes = [1, 16, 64], strides = [1, 1, 1]} : vector<1x23x64xbf16> to vector<1x16x64xbf16>
    %76 = vector.extract_strided_slice %69 {offsets = [0, 6, 0], sizes = [1, 16, 64], strides = [1, 1, 1]} : vector<1x23x64xbf16> to vector<1x16x64xbf16>
    %77 = vector.extract_strided_slice %69 {offsets = [0, 7, 0], sizes = [1, 16, 64], strides = [1, 1, 1]} : vector<1x23x64xbf16> to vector<1x16x64xbf16>
    %78 = tpu.concatenate %70, %71, %72, %73, %74, %75, %76, %77 in 2 : vector<1x16x64xbf16>, vector<1x16x64xbf16>, vector<1x16x64xbf16>, vector<1x16x64xbf16>, vector<1x16x64xbf16>, vector<1x16x64xbf16>, vector<1x16x64xbf16>, vector<1x16x64xbf16> -> vector<1x16x512xbf16>
    %79 = vector.shape_cast %78 : vector<1x16x512xbf16> to vector<16x512xbf16>
    %c0_32 = arith.constant 0 : index
    %c0_33 = arith.constant 0 : index
    %80 = vector.load %arg10[%c0_32, %c0_33] : memref<512x128xbf16, #tpu.memory_space<vmem>>, vector<512x128xbf16>
    %cst_34 = arith.constant dense<0.000000e+00> : vector<16x128xf32>
    %81 = tpu.matmul %79, %80, %cst_34 {dimension_numbers = #tpu.dot_dimension_numbers<[1], [0], [0], [1], [0, 0, 1, 1], [], []>} : vector<16x512xbf16>, vector<512x128xbf16>, vector<16x128xf32> -> vector<16x128xf32>
    %c0_35 = arith.constant 0 : index
    %c0_36 = arith.constant 0 : index
    %82 = vector.load %arg11[%c0_35, %c0_36] : memref<1x128xf32, #tpu.memory_space<vmem>>, vector<1x128xf32>
    %83 = vector.broadcast %82 : vector<1x128xf32> to vector<16x128xf32>
    %84 = arith.addf %81, %83 : vector<16x128xf32>
    %cst_37 = arith.constant 0.000000e+00 : f32
    %85 = vector.broadcast %cst_37 : f32 to vector<16x128xf32>
    %86 = arith.maximumf %84, %85 : vector<16x128xf32>
    %87 = arith.truncf %86 : vector<16x128xf32> to vector<16x128xbf16>
    %88 = vector.shape_cast %87 : vector<16x128xbf16> to vector<1x16x128xbf16>
    %cst_38 = arith.constant 0.000000e+00 : bf16
    %89 = vector.broadcast %cst_38 : bf16 to vector<1x2x128xbf16>
    %cst_39 = arith.constant 0.000000e+00 : bf16
    %90 = vector.broadcast %cst_39 : bf16 to vector<1x2x128xbf16>
    %91 = tpu.concatenate %89, %88, %90 in 1 : vector<1x2x128xbf16>, vector<1x16x128xbf16>, vector<1x2x128xbf16> -> vector<1x20x128xbf16>
    %92 = vector.extract_strided_slice %91 {offsets = [0, 0, 0], sizes = [1, 16, 128], strides = [1, 1, 1]} : vector<1x20x128xbf16> to vector<1x16x128xbf16>
    %93 = vector.extract_strided_slice %91 {offsets = [0, 1, 0], sizes = [1, 16, 128], strides = [1, 1, 1]} : vector<1x20x128xbf16> to vector<1x16x128xbf16>
    %94 = vector.extract_strided_slice %91 {offsets = [0, 2, 0], sizes = [1, 16, 128], strides = [1, 1, 1]} : vector<1x20x128xbf16> to vector<1x16x128xbf16>
    %95 = vector.extract_strided_slice %91 {offsets = [0, 3, 0], sizes = [1, 16, 128], strides = [1, 1, 1]} : vector<1x20x128xbf16> to vector<1x16x128xbf16>
    %96 = vector.extract_strided_slice %91 {offsets = [0, 4, 0], sizes = [1, 16, 128], strides = [1, 1, 1]} : vector<1x20x128xbf16> to vector<1x16x128xbf16>
    %97 = tpu.concatenate %92, %93, %94, %95, %96 in 2 : vector<1x16x128xbf16>, vector<1x16x128xbf16>, vector<1x16x128xbf16>, vector<1x16x128xbf16>, vector<1x16x128xbf16> -> vector<1x16x640xbf16>
    %98 = vector.shape_cast %97 : vector<1x16x640xbf16> to vector<16x640xbf16>
    %c0_40 = arith.constant 0 : index
    %c0_41 = arith.constant 0 : index
    %99 = vector.load %arg12[%c0_40, %c0_41] : memref<640x128xbf16, #tpu.memory_space<vmem>>, vector<640x128xbf16>
    %cst_42 = arith.constant dense<0.000000e+00> : vector<16x128xf32>
    %100 = tpu.matmul %98, %99, %cst_42 {dimension_numbers = #tpu.dot_dimension_numbers<[1], [0], [0], [1], [0, 0, 1, 1], [], []>} : vector<16x640xbf16>, vector<640x128xbf16>, vector<16x128xf32> -> vector<16x128xf32>
    %c0_43 = arith.constant 0 : index
    %c0_44 = arith.constant 0 : index
    %101 = vector.load %arg13[%c0_43, %c0_44] : memref<1x128xf32, #tpu.memory_space<vmem>>, vector<1x128xf32>
    %102 = vector.broadcast %101 : vector<1x128xf32> to vector<16x128xf32>
    %103 = arith.addf %100, %102 : vector<16x128xf32>
    %cst_45 = arith.constant 0.000000e+00 : f32
    %104 = vector.broadcast %cst_45 : f32 to vector<16x128xf32>
    %105 = arith.maximumf %103, %104 : vector<16x128xf32>
    %106 = arith.truncf %105 : vector<16x128xf32> to vector<16x128xbf16>
    %107 = vector.shape_cast %106 : vector<16x128xbf16> to vector<1x16x128xbf16>
    %cst_46 = arith.constant 0.000000e+00 : bf16
    %108 = vector.broadcast %cst_46 : bf16 to vector<1x1x128xbf16>
    %cst_47 = arith.constant 0.000000e+00 : bf16
    %109 = vector.broadcast %cst_47 : bf16 to vector<1x1x128xbf16>
    %110 = tpu.concatenate %108, %107, %109 in 1 : vector<1x1x128xbf16>, vector<1x16x128xbf16>, vector<1x1x128xbf16> -> vector<1x18x128xbf16>
    %111 = vector.extract_strided_slice %110 {offsets = [0, 0, 0], sizes = [1, 16, 128], strides = [1, 1, 1]} : vector<1x18x128xbf16> to vector<1x16x128xbf16>
    %112 = vector.extract_strided_slice %110 {offsets = [0, 1, 0], sizes = [1, 16, 128], strides = [1, 1, 1]} : vector<1x18x128xbf16> to vector<1x16x128xbf16>
    %113 = vector.extract_strided_slice %110 {offsets = [0, 2, 0], sizes = [1, 16, 128], strides = [1, 1, 1]} : vector<1x18x128xbf16> to vector<1x16x128xbf16>
    %114 = tpu.concatenate %111, %112, %113 in 2 : vector<1x16x128xbf16>, vector<1x16x128xbf16>, vector<1x16x128xbf16> -> vector<1x16x384xbf16>
    %115 = vector.shape_cast %114 : vector<1x16x384xbf16> to vector<16x384xbf16>
    %c0_48 = arith.constant 0 : index
    %c0_49 = arith.constant 0 : index
    %116 = vector.load %arg14[%c0_48, %c0_49] : memref<384x128xbf16, #tpu.memory_space<vmem>>, vector<384x128xbf16>
    %cst_50 = arith.constant dense<0.000000e+00> : vector<16x128xf32>
    %117 = tpu.matmul %115, %116, %cst_50 {dimension_numbers = #tpu.dot_dimension_numbers<[1], [0], [0], [1], [0, 0, 1, 1], [], []>} : vector<16x384xbf16>, vector<384x128xbf16>, vector<16x128xf32> -> vector<16x128xf32>
    %c0_51 = arith.constant 0 : index
    %c0_52 = arith.constant 0 : index
    %118 = vector.load %arg15[%c0_51, %c0_52] : memref<1x128xf32, #tpu.memory_space<vmem>>, vector<1x128xf32>
    %119 = vector.broadcast %118 : vector<1x128xf32> to vector<16x128xf32>
    %120 = arith.addf %117, %119 : vector<16x128xf32>
    %cst_53 = arith.constant 0.000000e+00 : f32
    %121 = vector.broadcast %cst_53 : f32 to vector<16x128xf32>
    %122 = arith.maximumf %120, %121 : vector<16x128xf32>
    %123 = vector.shape_cast %66 : vector<1x16x64xbf16> to vector<16x64xbf16>
    %c0_54 = arith.constant 0 : index
    %c0_55 = arith.constant 0 : index
    %124 = vector.load %arg16[%c0_54, %c0_55] : memref<64x128xbf16, #tpu.memory_space<vmem>>, vector<64x128xbf16>
    %cst_56 = arith.constant dense<0.000000e+00> : vector<16x128xf32>
    %125 = tpu.matmul %123, %124, %cst_56 {dimension_numbers = #tpu.dot_dimension_numbers<[1], [0], [0], [1], [0, 0, 1, 1], [], []>} : vector<16x64xbf16>, vector<64x128xbf16>, vector<16x128xf32> -> vector<16x128xf32>
    %c0_57 = arith.constant 0 : index
    %c0_58 = arith.constant 0 : index
    %126 = vector.load %arg17[%c0_57, %c0_58] : memref<1x128xf32, #tpu.memory_space<vmem>>, vector<1x128xf32>
    %127 = vector.broadcast %126 : vector<1x128xf32> to vector<16x128xf32>
    %128 = arith.addf %125, %127 : vector<16x128xf32>
    %129 = arith.addf %122, %128 : vector<16x128xf32>
    %130 = vector.shape_cast %129 : vector<16x128xf32> to vector<1x16x128xf32>
    %131 = arith.truncf %130 : vector<1x16x128xf32> to vector<1x16x128xbf16>
    %cst_59 = arith.constant 0.000000e+00 : bf16
    %132 = vector.broadcast %cst_59 : bf16 to vector<1x3x128xbf16>
    %cst_60 = arith.constant 0.000000e+00 : bf16
    %133 = vector.broadcast %cst_60 : bf16 to vector<1x4x128xbf16>
    %134 = tpu.concatenate %132, %131, %133 in 1 : vector<1x3x128xbf16>, vector<1x16x128xbf16>, vector<1x4x128xbf16> -> vector<1x23x128xbf16>
    %135 = vector.extract_strided_slice %134 {offsets = [0, 0, 0], sizes = [1, 16, 128], strides = [1, 1, 1]} : vector<1x23x128xbf16> to vector<1x16x128xbf16>
    %136 = vector.extract_strided_slice %134 {offsets = [0, 1, 0], sizes = [1, 16, 128], strides = [1, 1, 1]} : vector<1x23x128xbf16> to vector<1x16x128xbf16>
    %137 = vector.extract_strided_slice %134 {offsets = [0, 2, 0], sizes = [1, 16, 128], strides = [1, 1, 1]} : vector<1x23x128xbf16> to vector<1x16x128xbf16>
    %138 = vector.extract_strided_slice %134 {offsets = [0, 3, 0], sizes = [1, 16, 128], strides = [1, 1, 1]} : vector<1x23x128xbf16> to vector<1x16x128xbf16>
    %139 = vector.extract_strided_slice %134 {offsets = [0, 4, 0], sizes = [1, 16, 128], strides = [1, 1, 1]} : vector<1x23x128xbf16> to vector<1x16x128xbf16>
    %140 = vector.extract_strided_slice %134 {offsets = [0, 5, 0], sizes = [1, 16, 128], strides = [1, 1, 1]} : vector<1x23x128xbf16> to vector<1x16x128xbf16>
    %141 = vector.extract_strided_slice %134 {offsets = [0, 6, 0], sizes = [1, 16, 128], strides = [1, 1, 1]} : vector<1x23x128xbf16> to vector<1x16x128xbf16>
    %142 = vector.extract_strided_slice %134 {offsets = [0, 7, 0], sizes = [1, 16, 128], strides = [1, 1, 1]} : vector<1x23x128xbf16> to vector<1x16x128xbf16>
    %143 = tpu.concatenate %135, %136, %137, %138, %139, %140, %141, %142 in 2 : vector<1x16x128xbf16>, vector<1x16x128xbf16>, vector<1x16x128xbf16>, vector<1x16x128xbf16>, vector<1x16x128xbf16>, vector<1x16x128xbf16>, vector<1x16x128xbf16>, vector<1x16x128xbf16> -> vector<1x16x1024xbf16>
    %144 = vector.shape_cast %143 : vector<1x16x1024xbf16> to vector<16x1024xbf16>
    %c0_61 = arith.constant 0 : index
    %c0_62 = arith.constant 0 : index
    %145 = vector.load %arg18[%c0_61, %c0_62] : memref<1024x128xbf16, #tpu.memory_space<vmem>>, vector<1024x128xbf16>
    %cst_63 = arith.constant dense<0.000000e+00> : vector<16x128xf32>
    %146 = tpu.matmul %144, %145, %cst_63 {dimension_numbers = #tpu.dot_dimension_numbers<[1], [0], [0], [1], [0, 0, 1, 1], [], []>} : vector<16x1024xbf16>, vector<1024x128xbf16>, vector<16x128xf32> -> vector<16x128xf32>
    %c0_64 = arith.constant 0 : index
    %c0_65 = arith.constant 0 : index
    %147 = vector.load %arg19[%c0_64, %c0_65] : memref<1x128xf32, #tpu.memory_space<vmem>>, vector<1x128xf32>
    %148 = vector.broadcast %147 : vector<1x128xf32> to vector<16x128xf32>
    %149 = arith.addf %146, %148 : vector<16x128xf32>
    %cst_66 = arith.constant 0.000000e+00 : f32
    %150 = vector.broadcast %cst_66 : f32 to vector<16x128xf32>
    %151 = arith.maximumf %149, %150 : vector<16x128xf32>
    %152 = arith.truncf %151 : vector<16x128xf32> to vector<16x128xbf16>
    %153 = vector.shape_cast %152 : vector<16x128xbf16> to vector<1x16x128xbf16>
    %cst_67 = arith.constant 0.000000e+00 : bf16
    %154 = vector.broadcast %cst_67 : bf16 to vector<1x2x128xbf16>
    %cst_68 = arith.constant 0.000000e+00 : bf16
    %155 = vector.broadcast %cst_68 : bf16 to vector<1x2x128xbf16>
    %156 = tpu.concatenate %154, %153, %155 in 1 : vector<1x2x128xbf16>, vector<1x16x128xbf16>, vector<1x2x128xbf16> -> vector<1x20x128xbf16>
    %157 = vector.extract_strided_slice %156 {offsets = [0, 0, 0], sizes = [1, 16, 128], strides = [1, 1, 1]} : vector<1x20x128xbf16> to vector<1x16x128xbf16>
    %158 = vector.extract_strided_slice %156 {offsets = [0, 1, 0], sizes = [1, 16, 128], strides = [1, 1, 1]} : vector<1x20x128xbf16> to vector<1x16x128xbf16>
    %159 = vector.extract_strided_slice %156 {offsets = [0, 2, 0], sizes = [1, 16, 128], strides = [1, 1, 1]} : vector<1x20x128xbf16> to vector<1x16x128xbf16>
    %160 = vector.extract_strided_slice %156 {offsets = [0, 3, 0], sizes = [1, 16, 128], strides = [1, 1, 1]} : vector<1x20x128xbf16> to vector<1x16x128xbf16>
    %161 = vector.extract_strided_slice %156 {offsets = [0, 4, 0], sizes = [1, 16, 128], strides = [1, 1, 1]} : vector<1x20x128xbf16> to vector<1x16x128xbf16>
    %162 = tpu.concatenate %157, %158, %159, %160, %161 in 2 : vector<1x16x128xbf16>, vector<1x16x128xbf16>, vector<1x16x128xbf16>, vector<1x16x128xbf16>, vector<1x16x128xbf16> -> vector<1x16x640xbf16>
    %163 = vector.shape_cast %162 : vector<1x16x640xbf16> to vector<16x640xbf16>
    %c0_69 = arith.constant 0 : index
    %c0_70 = arith.constant 0 : index
    %164 = vector.load %arg20[%c0_69, %c0_70] : memref<640x128xbf16, #tpu.memory_space<vmem>>, vector<640x128xbf16>
    %cst_71 = arith.constant dense<0.000000e+00> : vector<16x128xf32>
    %165 = tpu.matmul %163, %164, %cst_71 {dimension_numbers = #tpu.dot_dimension_numbers<[1], [0], [0], [1], [0, 0, 1, 1], [], []>} : vector<16x640xbf16>, vector<640x128xbf16>, vector<16x128xf32> -> vector<16x128xf32>
    %c0_72 = arith.constant 0 : index
    %c0_73 = arith.constant 0 : index
    %166 = vector.load %arg21[%c0_72, %c0_73] : memref<1x128xf32, #tpu.memory_space<vmem>>, vector<1x128xf32>
    %167 = vector.broadcast %166 : vector<1x128xf32> to vector<16x128xf32>
    %168 = arith.addf %165, %167 : vector<16x128xf32>
    %cst_74 = arith.constant 0.000000e+00 : f32
    %169 = vector.broadcast %cst_74 : f32 to vector<16x128xf32>
    %170 = arith.maximumf %168, %169 : vector<16x128xf32>
    %171 = arith.truncf %170 : vector<16x128xf32> to vector<16x128xbf16>
    %172 = vector.shape_cast %171 : vector<16x128xbf16> to vector<1x16x128xbf16>
    %cst_75 = arith.constant 0.000000e+00 : bf16
    %173 = vector.broadcast %cst_75 : bf16 to vector<1x1x128xbf16>
    %cst_76 = arith.constant 0.000000e+00 : bf16
    %174 = vector.broadcast %cst_76 : bf16 to vector<1x1x128xbf16>
    %175 = tpu.concatenate %173, %172, %174 in 1 : vector<1x1x128xbf16>, vector<1x16x128xbf16>, vector<1x1x128xbf16> -> vector<1x18x128xbf16>
    %176 = vector.extract_strided_slice %175 {offsets = [0, 0, 0], sizes = [1, 16, 128], strides = [1, 1, 1]} : vector<1x18x128xbf16> to vector<1x16x128xbf16>
    %177 = vector.extract_strided_slice %175 {offsets = [0, 1, 0], sizes = [1, 16, 128], strides = [1, 1, 1]} : vector<1x18x128xbf16> to vector<1x16x128xbf16>
    %178 = vector.extract_strided_slice %175 {offsets = [0, 2, 0], sizes = [1, 16, 128], strides = [1, 1, 1]} : vector<1x18x128xbf16> to vector<1x16x128xbf16>
    %179 = tpu.concatenate %176, %177, %178 in 2 : vector<1x16x128xbf16>, vector<1x16x128xbf16>, vector<1x16x128xbf16> -> vector<1x16x384xbf16>
    %180 = vector.shape_cast %179 : vector<1x16x384xbf16> to vector<16x384xbf16>
    %c0_77 = arith.constant 0 : index
    %c0_78 = arith.constant 0 : index
    %181 = vector.load %arg22[%c0_77, %c0_78] : memref<384x128xbf16, #tpu.memory_space<vmem>>, vector<384x128xbf16>
    %cst_79 = arith.constant dense<0.000000e+00> : vector<16x128xf32>
    %182 = tpu.matmul %180, %181, %cst_79 {dimension_numbers = #tpu.dot_dimension_numbers<[1], [0], [0], [1], [0, 0, 1, 1], [], []>} : vector<16x384xbf16>, vector<384x128xbf16>, vector<16x128xf32> -> vector<16x128xf32>
    %c0_80 = arith.constant 0 : index
    %c0_81 = arith.constant 0 : index
    %183 = vector.load %arg23[%c0_80, %c0_81] : memref<1x128xf32, #tpu.memory_space<vmem>>, vector<1x128xf32>
    %184 = vector.broadcast %183 : vector<1x128xf32> to vector<16x128xf32>
    %185 = arith.addf %182, %184 : vector<16x128xf32>
    %cst_82 = arith.constant 0.000000e+00 : f32
    %186 = vector.broadcast %cst_82 : f32 to vector<16x128xf32>
    %187 = arith.maximumf %185, %186 : vector<16x128xf32>
    %188 = vector.shape_cast %187 : vector<16x128xf32> to vector<1x16x128xf32>
    %cst_83 = arith.constant dense<0.000000e+00> : vector<1x128xf32>
    %189 = vector.multi_reduction <add>, %188, %cst_83 [1] : vector<1x16x128xf32> to vector<1x128xf32>
    %cst_84 = arith.constant 1.600000e+01 : f32
    %190 = vector.broadcast %cst_84 : f32 to vector<1x128xf32>
    %191 = arith.divf %189, %190 : vector<1x128xf32>
    %192 = arith.truncf %191 : vector<1x128xf32> to vector<1x128xbf16>
    %c0_85 = arith.constant 0 : index
    %c0_86 = arith.constant 0 : index
    %193 = vector.load %arg24[%c0_85, %c0_86] : memref<128x3xbf16, #tpu.memory_space<vmem>>, vector<128x3xbf16>
    %cst_87 = arith.constant dense<0.000000e+00> : vector<1x3xf32>
    %194 = tpu.matmul %192, %193, %cst_87 {dimension_numbers = #tpu.dot_dimension_numbers<[1], [0], [0], [1], [0, 0, 1, 1], [], []>} : vector<1x128xbf16>, vector<128x3xbf16>, vector<1x3xf32> -> vector<1x3xf32>
    %c0_88 = arith.constant 0 : index
    %c0_89 = arith.constant 0 : index
    %195 = vector.load %arg25[%c0_88, %c0_89] : memref<1x3xf32, #tpu.memory_space<vmem>>, vector<1x3xf32>
    %196 = arith.addf %194, %195 : vector<1x3xf32>
    %197 = vector.shape_cast %196 : vector<1x3xf32> to vector<1x1x3xf32>
    %c0_90 = arith.constant 0 : index
    %c0_91 = arith.constant 0 : index
    %c0_92 = arith.constant 0 : index
    %198 = vector.load %arg26[%c0_90, %c0_91, %c0_92] : memref<1x1x3xf32, #tpu.memory_space<vmem>>, vector<1x1x3xf32>
    tpu.vector_store %arg26[%c0_90, %c0_91, %c0_92], %197 {strides = array<i32>} : memref<1x1x3xf32, #tpu.memory_space<vmem>>, vector<1x1x3xf32>,
    return
  }
  func.func @transform_0(%arg0: i32) -> (i32, i32, i32) {
    %c0_i32 = arith.constant 0 : i32
    %c0_i32_0 = arith.constant 0 : i32
    %c0_i32_1 = arith.constant 0 : i32
    return %arg0, %c0_i32, %c0_i32_0 : i32, i32, i32
  }
  func.func @transform_1(%arg0: i32) -> (i32, i32) {
    %c0_i32 = arith.constant 0 : i32
    %c0_i32_0 = arith.constant 0 : i32
    %c0_i32_1 = arith.constant 0 : i32
    return %c0_i32, %c0_i32_0 : i32, i32
  }
  func.func @transform_2(%arg0: i32) -> (i32, i32) {
    %c0_i32 = arith.constant 0 : i32
    %c0_i32_0 = arith.constant 0 : i32
    %c0_i32_1 = arith.constant 0 : i32
    return %c0_i32, %c0_i32_0 : i32, i32
  }
  func.func @transform_3(%arg0: i32) -> (i32, i32) {
    %c0_i32 = arith.constant 0 : i32
    %c0_i32_0 = arith.constant 0 : i32
    %c0_i32_1 = arith.constant 0 : i32
    return %c0_i32, %c0_i32_0 : i32, i32
  }
  func.func @transform_4(%arg0: i32) -> (i32, i32) {
    %c0_i32 = arith.constant 0 : i32
    %c0_i32_0 = arith.constant 0 : i32
    %c0_i32_1 = arith.constant 0 : i32
    return %c0_i32, %c0_i32_0 : i32, i32
  }
  func.func @transform_5(%arg0: i32) -> (i32, i32) {
    %c0_i32 = arith.constant 0 : i32
    %c0_i32_0 = arith.constant 0 : i32
    %c0_i32_1 = arith.constant 0 : i32
    return %c0_i32, %c0_i32_0 : i32, i32
  }
  func.func @transform_6(%arg0: i32) -> (i32, i32) {
    %c0_i32 = arith.constant 0 : i32
    %c0_i32_0 = arith.constant 0 : i32
    %c0_i32_1 = arith.constant 0 : i32
    return %c0_i32, %c0_i32_0 : i32, i32
  }
  func.func @transform_7(%arg0: i32) -> (i32, i32) {
    %c0_i32 = arith.constant 0 : i32
    %c0_i32_0 = arith.constant 0 : i32
    %c0_i32_1 = arith.constant 0 : i32
    return %c0_i32, %c0_i32_0 : i32, i32
  }
  func.func @transform_8(%arg0: i32) -> (i32, i32) {
    %c0_i32 = arith.constant 0 : i32
    %c0_i32_0 = arith.constant 0 : i32
    %c0_i32_1 = arith.constant 0 : i32
    return %c0_i32, %c0_i32_0 : i32, i32
  }
  func.func @transform_9(%arg0: i32) -> (i32, i32) {
    %c0_i32 = arith.constant 0 : i32
    %c0_i32_0 = arith.constant 0 : i32
    %c0_i32_1 = arith.constant 0 : i32
    return %c0_i32, %c0_i32_0 : i32, i32
  }
  func.func @transform_10(%arg0: i32) -> (i32, i32) {
    %c0_i32 = arith.constant 0 : i32
    %c0_i32_0 = arith.constant 0 : i32
    %c0_i32_1 = arith.constant 0 : i32
    return %c0_i32, %c0_i32_0 : i32, i32
  }
  func.func @transform_11(%arg0: i32) -> (i32, i32) {
    %c0_i32 = arith.constant 0 : i32
    %c0_i32_0 = arith.constant 0 : i32
    %c0_i32_1 = arith.constant 0 : i32
    return %c0_i32, %c0_i32_0 : i32, i32
  }
  func.func @transform_12(%arg0: i32) -> (i32, i32) {
    %c0_i32 = arith.constant 0 : i32
    %c0_i32_0 = arith.constant 0 : i32
    %c0_i32_1 = arith.constant 0 : i32
    return %c0_i32, %c0_i32_0 : i32, i32
  }
  func.func @transform_13(%arg0: i32) -> (i32, i32) {
    %c0_i32 = arith.constant 0 : i32
    %c0_i32_0 = arith.constant 0 : i32
    %c0_i32_1 = arith.constant 0 : i32
    return %c0_i32, %c0_i32_0 : i32, i32
  }
  func.func @transform_14(%arg0: i32) -> (i32, i32) {
    %c0_i32 = arith.constant 0 : i32
    %c0_i32_0 = arith.constant 0 : i32
    %c0_i32_1 = arith.constant 0 : i32
    return %c0_i32, %c0_i32_0 : i32, i32
  }
  func.func @transform_15(%arg0: i32) -> (i32, i32) {
    %c0_i32 = arith.constant 0 : i32
    %c0_i32_0 = arith.constant 0 : i32
    %c0_i32_1 = arith.constant 0 : i32
    return %c0_i32, %c0_i32_0 : i32, i32
  }
  func.func @transform_16(%arg0: i32) -> (i32, i32) {
    %c0_i32 = arith.constant 0 : i32
    %c0_i32_0 = arith.constant 0 : i32
    %c0_i32_1 = arith.constant 0 : i32
    return %c0_i32, %c0_i32_0 : i32, i32
  }
  func.func @transform_17(%arg0: i32) -> (i32, i32) {
    %c0_i32 = arith.constant 0 : i32
    %c0_i32_0 = arith.constant 0 : i32
    %c0_i32_1 = arith.constant 0 : i32
    return %c0_i32, %c0_i32_0 : i32, i32
  }
  func.func @transform_18(%arg0: i32) -> (i32, i32) {
    %c0_i32 = arith.constant 0 : i32
    %c0_i32_0 = arith.constant 0 : i32
    %c0_i32_1 = arith.constant 0 : i32
    return %c0_i32, %c0_i32_0 : i32, i32
  }
  func.func @transform_19(%arg0: i32) -> (i32, i32) {
    %c0_i32 = arith.constant 0 : i32
    %c0_i32_0 = arith.constant 0 : i32
    %c0_i32_1 = arith.constant 0 : i32
    return %c0_i32, %c0_i32_0 : i32, i32
  }
  func.func @transform_20(%arg0: i32) -> (i32, i32) {
    %c0_i32 = arith.constant 0 : i32
    %c0_i32_0 = arith.constant 0 : i32
    %c0_i32_1 = arith.constant 0 : i32
    return %c0_i32, %c0_i32_0 : i32, i32
  }
  func.func @transform_21(%arg0: i32) -> (i32, i32) {
    %c0_i32 = arith.constant 0 : i32
    %c0_i32_0 = arith.constant 0 : i32
    %c0_i32_1 = arith.constant 0 : i32
    return %c0_i32, %c0_i32_0 : i32, i32
  }
  func.func @transform_22(%arg0: i32) -> (i32, i32) {
    %c0_i32 = arith.constant 0 : i32
    %c0_i32_0 = arith.constant 0 : i32
    %c0_i32_1 = arith.constant 0 : i32
    return %c0_i32, %c0_i32_0 : i32, i32
  }
  func.func @transform_23(%arg0: i32) -> (i32, i32) {
    %c0_i32 = arith.constant 0 : i32
    %c0_i32_0 = arith.constant 0 : i32
    %c0_i32_1 = arith.constant 0 : i32
    return %c0_i32, %c0_i32_0 : i32, i32
  }
  func.func @transform_24(%arg0: i32) -> (i32, i32) {
    %c0_i32 = arith.constant 0 : i32
    %c0_i32_0 = arith.constant 0 : i32
    %c0_i32_1 = arith.constant 0 : i32
    return %c0_i32, %c0_i32_0 : i32, i32
  }
  func.func @transform_25(%arg0: i32) -> (i32, i32, i32) {
    %c0_i32 = arith.constant 0 : i32
    %c0_i32_0 = arith.constant 0 : i32
    %c0_i32_1 = arith.constant 0 : i32
    return %arg0, %c0_i32, %c0_i32_0 : i32, i32, i32
  }
}

</mosaic_0001>

<bundles_post_ra>
// kernel: _lambda_.1
= control target key start
LH: loop header
LB: loop body
LE: loop exit
PB: predicated region body
PF: predicated region fallthrough
CT: control target
= control target key end

     0   :  { %s7322_s0 = inlined_call_operand.vmem [shape: f32[2,16,4], index: 0, kind: input, shape index: {}]   ;;  %s7323_s1 = inlined_call_operand.vmem [shape: bf16[32,64], index: 1, kind: input, shape index: {}]   ;;  %s7324_s2 = inlined_call_operand.hbm [shape: f32[1,64], index: 2, kind: input, shape index: {}]   ;;  %s7325_s3 = inlined_call_operand.hbm [shape: bf16[320,64], index: 3, kind: input, shape index: {}]   ;;  %s7326_s4 = inlined_call_operand.hbm [shape: f32[1,64], index: 4, kind: input, shape index: {}]   ;;  %s7327_s5 = inlined_call_operand.hbm [shape: bf16[192,64], index: 5, kind: input, shape index: {}]   ;;  %s7328_s6 = inlined_call_operand.hbm [shape: f32[1,64], index: 6, kind: input, shape index: {}]   ;;  %s7329_s7 = inlined_call_operand.vmem [shape: bf16[4,64], index: 7, kind: input, shape index: {}]   ;;  %s7330_s8 = inlined_call_operand.hbm [shape: f32[1,64], index: 8, kind: input, shape index: {}]   ;;  %s7331_s9 = inlined_call_operand.hbm [shape: bf16[512,128], index: 9, kind: input, shape index: {}]   ;;  %s7332_s10 = inlined_call_operand.hbm [shape: f32[1,128], index: 10, kind: input, shape index: {}]   ;;  %s7333_s11 = inlined_call_operand.hbm [shape: bf16[640,128], index: 11, kind: input, shape index: {}]   ;;  %s7334_s12 = inlined_call_operand.hbm [shape: f32[1,128], index: 12, kind: input, shape index: {}]   ;;  %s7335_s13 = inlined_call_operand.hbm [shape: bf16[384,128], index: 13, kind: input, shape index: {}]   ;;  %s7336_s14 = inlined_call_operand.hbm [shape: f32[1,128], index: 14, kind: input, shape index: {}]   ;;  %s7337_s15 = inlined_call_operand.vmem [shape: bf16[64,128], index: 15, kind: input, shape index: {}]   ;;  %s7338_s16 = inlined_call_operand.vmem [shape: f32[1,128], index: 16, kind: input, shape index: {}]   ;;  %s7339_s17 = inlined_call_operand.hbm [shape: bf16[1024,128], index: 17, kind: input, shape index: {}]   ;;  %s7340_s18 = inlined_call_operand.vmem [shape: f32[1,128], index: 18, kind: input, shape index: {}]   ;;  %s7341_s19 = inlined_call_operand.hbm [shape: bf16[640,128], index: 19, kind: input, shape index: {}]   ;;  %s7342_s20 = inlined_call_operand.vmem [shape: f32[1,128], index: 20, kind: input, shape index: {}]   ;;  %s7343_s21 = inlined_call_operand.hbm [shape: bf16[384,128], index: 21, kind: input, shape index: {}]   ;;  %s7344_s22 = inlined_call_operand.vmem [shape: f32[1,128], index: 22, kind: input, shape index: {}]   ;;  %s7345_s23 = inlined_call_operand.hbm [shape: bf16[128,3], index: 23, kind: input, shape index: {}]   ;;  %s7346_s24 = inlined_call_operand.vmem [shape: f32[1,3], index: 24, kind: input, shape index: {}]   ;;  %s7347_s25 = inlined_call_operand.hbm [shape: f32[2,1,3], index: 25, kind: output, shape index: {}]  }
   0x1   :  { %7362 = sst [smem:[#allocation47_spill]] %s7322_s0 }
   0x2   :  { %7363 = sst [smem:[#allocation48_spill]] %s7323_s1 }
   0x3   :  { %7364 = sst [smem:[#allocation49_spill]] %s7324_s2 }
   0x4   :  { %7365 = sst [smem:[#allocation50_spill]] %s7325_s3 }
   0x5   :  { %7366 = sst [smem:[#allocation51_spill]] %s7326_s4 }
   0x6   :  { %7367 = sst [smem:[#allocation52_spill]] %s7327_s5 }
   0x7   :  { %7368 = sst [smem:[#allocation53_spill]] %s7328_s6 }
   0x8   :  { %7369 = sst [smem:[#allocation54_spill]] %s7329_s7 }
   0x9   :  { %7370 = sst [smem:[#allocation55_spill]] %s7330_s8 }
   0xa   :  { %7371 = sst [smem:[#allocation56_spill]] %s7331_s9 }
   0xb   :  { %7372 = sst [smem:[#allocation57_spill]] %s7332_s10 }
   0xc   :  { %7373 = sst [smem:[#allocation58_spill]] %s7334_s12 }
   0xd   :  { %7374 = sst [smem:[#allocation59_spill]] %s7344_s22 }
   0xe   :  { %7375 = sst [smem:[#allocation60_spill]] %s7346_s24 }
   0xf   :  { %7376 = sst [smem:[#allocation61_spill]] %s7347_s25 }
  0x10   :  { %30 = vsyncpa [#allocation3], 0 }
  0x11   :  { %31 = vsyncpa [#allocation6], 0 }
  0x12   :  { %32 = vsyncpa [#allocation9], 0 }
  0x13   :  { %33 = vsyncpa [#allocation12], 0 }
  0x14   :  { %34 = vsyncpa [#allocation15], 0 }
  0x15   :  { %35 = vsyncpa [#allocation18], 0 }
  0x16   :  { %36 = vsyncpa [#allocation21], 0 }
  0x17   :  { %37 = vsyncpa [#allocation24], 0 }
  0x18   :  { %38 = vsyncpa [#allocation27], 0 }
  0x19   :  { %39 = vsyncpa [#allocation4], 0 }
  0x1a   :  { %41 = vsyncpa [#allocation4 + $0x1], 0  ;;  %s6902_s29 = smov 0   ;;  %s6904_s2 = smov 0  }
  0x1b   :  { %s6906_s6 = smov 0   ;;  %s6908_s30 = smov 0  }
  0x1c LB: > { %7377 = sst [smem:[#allocation39_spill]] %s6731_s29  ;;  %s6923_s7 = sadd.s32 4294967295, %s6743_s30   ;;  %s6743_s30 = sphi %s6908_s30, %s7418_s30   ;;  %s6739_s6 = sphi %s6906_s6, %s7421_s6   ;;  %s6735_s2 = sphi %s6904_s2, %s7420_s2   ;;  %s6731_s29 = sphi %s6902_s29, %s7419_s29  }
  0x1d   : > { %7378 = sst [smem:[#allocation40_spill]] %s6735_s2  ;;  %s4541_s3 = sadd.s32 4294967294, %s6743_s30  }
  0x1e   : > { %7379 = sst [smem:[#allocation41_spill]] %s6739_s6  ;;  %s6927_s26 = sadd.s32 1, %s6743_s30  }
  0x1f   : > { %7380 = sst [smem:[#allocation42_spill]] %s6743_s30  ;;  %s584_s1 = sadd.s32 1, %s6739_s6 }
  0x20   : > { %7381 = sst [smem:[#allocation43_spill]] %s6927_s26  ;;  %s581_s8 = ssub.s32 %s6743_s30, %s6927_s26 }
  0x21   : > { %p594_p0 = scmp.ne.s32.totalorder %s6739_s6, %s6735_s2  ;;  %p582_p1 = scmp.eq.s32.totalorder %s581_s8, 0 }
  0x22   : > { %p595_p2 = scmp.eq.s32.totalorder %s6923_s7, 1  ;;  %p600_p3 = scmp.ne.s32.totalorder %s6735_s2, %s6731_s29 }
  0x23   : > { %p601_p4 = scmp.eq.s32.totalorder %s4541_s3, 1  ;;  %p4542_p7 = scmp.ge.s32.totalorder %s6743_s30, 1 }
  0x24   : > { %s6938_s27 = scalar_select %p582_p1, %s6739_s6, %s584_s1  }
  0x25   : > { %p6940_p5 = por %p595_p2, %p594_p0  ;;  %p6944_p6 = por %p601_p4, %p600_p3 }
  0x26   : > { %7382 = sst [smem:[#allocation44_spill]] %s6938_s27  ;;  %p608_p8 = scmp.lt.s32.totalorder %s6743_s30, 3 }
  0x27   : > { %s7383_s4 = scalar_select %p6940_p5, 1, 0 }
  0x28   : > { %s7385_s28 = scalar_select %p6944_p6, 1, 0 }
  0x29   : > { %7384 = sst [smem:[#allocation45_spill]] %s7383_s4  ;;  %p6060_p9 = scmp.eq.s32.totalorder %s6923_s7, 0 }
  0x2a   : > { %7386 = sst [smem:[#allocation46_spill]] %s7385_s28  ;;  %p6951_p10 = pnand %p4542_p7, %p608_p8 }
  0x2b   : > { %s7388_s3 = sld [smem:[#allocation50_spill]]  ;;  %s6745_s8 = smov [#allocation5]  }
  0x2c   : > { %p6007_p11 = pneg %p6951_p10  ;;  %s636_s27 = sshll.u32 %s6745_s8, 4  ;;  %s637_s27 = int_to_ptr.vmem [resolvable:$true] %s636_s27 }
  0x2d   : > { %s7390_s29 = sld [smem:[#allocation52_spill]]  ;;  %s7359_s5 = smov 64  }
  0x2e   : > { %p6962_p12 = pnand %p6060_p9, %p6007_p11  ;;  %s6747_s0 = smov 4  }
  0x2f   : > { %s7391_s25 = sld [smem:[#allocation55_spill]]  ;;  %s6749_s22 = smov [#allocation11]  }
  0x30   : > { %s7392_s10 = sld [smem:[#allocation57_spill]]  ;;  %s6750_s24 = smov [#allocation14]  }
  0x31   : > { %s634_s1 = sshll.u32 %s7388_s3, 4  ;;  %s6748_s3 = smov [#allocation8]   ;;  %s635_s1 = int_to_ptr.hbm [resolvable:$true] %s634_s1 }
  0x32   : > { %6013 = dma.hbm_to_vmem [thread:$0]  (!%p6962_p12), %s635_s1, 2560, %s637_s27, [#allocation6], %s7359_s5, %s7359_s5, %s6747_s0  }
  0x33   : > { %s660_s30 = sshll.u32 %s7390_s29, 4  ;;  %s662_s8 = sshll.u32 %s6748_s3, 4  ;;  %s661_s30 = int_to_ptr.hbm [resolvable:$true] %s660_s30  ;;  %s663_s8 = int_to_ptr.vmem [resolvable:$true] %s662_s8 }
  0x34   : > { %6019 = dma.hbm_to_vmem [thread:$0]  (!%p6962_p12), %s661_s30, 1536, %s663_s8, [#allocation9], %s7359_s5, %s7359_s5, %s6747_s0  }
  0x35   : > { %s690_s2 = sshll.u32 %s7391_s25, 4  ;;  %s692_s27 = sshll.u32 %s6749_s22, 4  ;;  %s691_s2 = int_to_ptr.hbm [resolvable:$true] %s690_s2  ;;  %s693_s27 = int_to_ptr.vmem [resolvable:$true] %s692_s27 }
  0x36   : > { %s716_s28 = sshll.u32 %s7392_s10, 4  ;;  %s718_s25 = sshll.u32 %s6750_s24, 4  ;;  %s717_s28 = int_to_ptr.hbm [resolvable:$true] %s716_s28  ;;  %s719_s25 = int_to_ptr.vmem [resolvable:$true] %s718_s25 }
  0x37   : > { %6025 = dma.hbm_to_vmem [thread:$0]  (!%p6962_p12), %s691_s2, 16, %s693_s27, [#allocation12]  }
  0x38   : > { %s7393_s12 = sld [smem:[#allocation58_spill]]  ;;  %s768_s29 = sshll.u32 %s7336_s14, 4  ;;  %s769_s29 = int_to_ptr.hbm [resolvable:$true] %s768_s29 }
  0x39   : > { %6031 = dma.hbm_to_vmem [thread:$0]  (!%p6962_p12), %s717_s28, 16, %s719_s25, [#allocation15]  }
  0x3a   : > { %s6751_s22 = smov [#allocation17]   ;;  %s6752_s2 = smov [#allocation20]  }
  0x3b   : > { %s744_s26 = sshll.u32 %s6751_s22, 4  ;;  %s770_s27 = sshll.u32 %s6752_s2, 4  ;;  %s745_s26 = int_to_ptr.vmem [resolvable:$true] %s744_s26  ;;  %s771_s27 = int_to_ptr.vmem [resolvable:$true] %s770_s27 }
  0x3c   : > { %s802_s1 = sshll.u32 %s7341_s19, 4  ;;  %s7394_s30 = sld [smem:[#allocation49_spill]]  ;;  %s803_s1 = int_to_ptr.hbm [resolvable:$true] %s802_s1 }
  0x3d   : > { %6043 = dma.hbm_to_vmem [thread:$0]  (!%p6962_p12), %s769_s29, 16, %s771_s27, [#allocation21]  }
  0x3e   : > { %s742_s3 = sshll.u32 %s7393_s12, 4  ;;  %s6753_s22 = smov [#allocation23]   ;;  %s743_s3 = int_to_ptr.hbm [resolvable:$true] %s742_s3 }
  0x3f   : > { %6037 = dma.hbm_to_vmem [thread:$0]  (!%p6962_p12), %s743_s3, 16, %s745_s26, [#allocation18]  }
  0x40   : > { %s804_s5 = sshll.u32 %s6753_s22, 4  ;;  %s7395_s3 = smov 64   ;;  %s805_s5 = int_to_ptr.vmem [resolvable:$true] %s804_s5 }
  0x41   : > { %6049 = dma.hbm_to_vmem [thread:$0]  (!%p6962_p12), %s803_s1, 5120, %s805_s5, [#allocation24], %s7395_s3, %s7395_s3, %s6747_s0  }
  0x42   : > { %s623_s8 = sshll.u32 %s7394_s30, 4  ;;  %s6754_s26 = smov [#allocation2]   ;;  %s624_s8 = int_to_ptr.hbm [resolvable:$true] %s623_s8 }
  0x43   : > { %s625_s2 = sshll.u32 %s6754_s26, 4  ;;  %s7396_s10 = sld [smem:[#allocation51_spill]]  ;;  %s626_s2 = int_to_ptr.vmem [resolvable:$true] %s625_s2 }
  0x44   : > { %6010 = dma.hbm_to_vmem [thread:$0]  (!%p6962_p12), %s624_s8, 16, %s626_s2, [#allocation3]  }
  0x45   : > { %s7397_s25 = sld [smem:[#allocation53_spill]]  ;;  %s6755_s22 = smov [#allocation7]  }
  0x46   : > { %s651_s12 = sshll.u32 %s6755_s22, 4  ;;  %s6756_s5 = smov [#allocation10]   ;;  %s652_s12 = int_to_ptr.vmem [resolvable:$true] %s651_s12 }
  0x47   : > { %s677_s1 = sshll.u32 %s6756_s5, 4  ;;  %s727_s27 = sshll.u32 %s7333_s11, 4  ;;  %s678_s1 = int_to_ptr.vmem [resolvable:$true] %s677_s1  ;;  %s728_s27 = int_to_ptr.hbm [resolvable:$true] %s727_s27 }
  0x48   : > { %s6757_s28 = smov [#allocation13]   ;;  %s785_s24 = sshll.u32 %s7339_s17, 4  ;;  %s786_s24 = int_to_ptr.hbm [resolvable:$true] %s785_s24 }
  0x49   : > { %s649_s29 = sshll.u32 %s7396_s10, 4  ;;  %s7398_s10 = sld [smem:[#allocation56_spill]]  ;;  %s650_s29 = int_to_ptr.hbm [resolvable:$true] %s649_s29 }
  0x4a   : > { %6016 = dma.hbm_to_vmem [thread:$0]  (!%p6962_p12), %s650_s29, 16, %s652_s12, [#allocation6]  }
  0x4b   : > { %s675_s30 = sshll.u32 %s7397_s25, 4  ;;  %s703_s25 = sshll.u32 %s6757_s28, 4  ;;  %s676_s30 = int_to_ptr.hbm [resolvable:$true] %s675_s30  ;;  %s704_s25 = int_to_ptr.vmem [resolvable:$true] %s703_s25 }
  0x4c   : > { %6022 = dma.hbm_to_vmem [thread:$0]  (!%p6962_p12), %s676_s30, 16, %s678_s1, [#allocation9]  }
  0x4d   : > { %s6758_s12 = smov [#allocation16]   ;;  %s753_s30 = sshll.u32 %s7335_s13, 4  ;;  %s754_s30 = int_to_ptr.hbm [resolvable:$true] %s753_s30 }
  0x4e   : > { %s729_s29 = sshll.u32 %s6758_s12, 4  ;;  %s6760_s8 = smov [#allocation22]   ;;  %s730_s29 = int_to_ptr.vmem [resolvable:$true] %s729_s29 }
  0x4f   : > { %s701_s4 = sshll.u32 %s7398_s10, 4  ;;  %s6759_s10 = smov [#allocation19]   ;;  %s702_s4 = int_to_ptr.hbm [resolvable:$true] %s701_s4 }
  0x50   : > { %6028 = dma.hbm_to_vmem [thread:$0]  (!%p6962_p12), %s702_s4, 4096, %s704_s25, [#allocation12], %s7395_s3, %s7395_s3, %s6747_s0  }
  0x51   : > { %6034 = dma.hbm_to_vmem [thread:$0]  (!%p6962_p12), %s728_s27, 5120, %s730_s29, [#allocation15], %s7395_s3, %s7395_s3, %s6747_s0  }
  0x52   : > { %s755_s4 = sshll.u32 %s6759_s10, 4  ;;  %s787_s2 = sshll.u32 %s6760_s8, 4  ;;  %s756_s4 = int_to_ptr.vmem [resolvable:$true] %s755_s4  ;;  %s788_s2 = int_to_ptr.vmem [resolvable:$true] %s787_s2 }
  0x53   : > { %6040 = dma.hbm_to_vmem [thread:$0]  (!%p6962_p12), %s754_s30, 3072, %s756_s4, [#allocation18], %s7395_s3, %s7395_s3, %s6747_s0  }
  0x54   : > { %s819_s27 = sshll.u32 %s7343_s21, 4  ;;  %s836_s22 = sshll.u32 %s7345_s23, 4  ;;  %s820_s27 = int_to_ptr.hbm [resolvable:$true] %s819_s27  ;;  %s837_s22 = int_to_ptr.hbm [resolvable:$true] %s836_s22 }
  0x55   : > { %6046 = dma.hbm_to_vmem [thread:$0]  (!%p6962_p12), %s786_s24, 8192, %s788_s2, [#allocation21], %s7395_s3, %s7395_s3, %s6747_s0  }
  0x56   : > { %s6761_s5 = smov [#allocation25]   ;;  %s6762_s1 = smov [#allocation26]  }
  0x57   : > { %s821_s30 = sshll.u32 %s6761_s5, 4  ;;  %s838_s26 = sshll.u32 %s6762_s1, 4  ;;  %s822_s30 = int_to_ptr.vmem [resolvable:$true] %s821_s30  ;;  %s839_s26 = int_to_ptr.vmem [resolvable:$true] %s838_s26 }
  0x58   : > { %6052 = dma.hbm_to_vmem [thread:$0]  (!%p6962_p12), %s820_s27, 3072, %s822_s30, [#allocation24], %s7395_s3, %s7395_s3, %s6747_s0  }
  0x59   : > { %6055 = dma.hbm_to_vmem [thread:$0]  (!%p6962_p12), %s837_s22, 1024, %s839_s26, [#allocation27], %s7395_s3, %s7395_s3, %s6747_s0  }
  0x5a   : > { %865 = sbr.rel (%p6951_p10) target bundleno = 2249 (0x8c9), region = 120 }
  0x5f   : > { %6690 = dma.done.wait (%p6060_p9), [#allocation3], 16  }
  0x60   : > { %6692 = vsyncadd (%p6060_p9), [#allocation3], 4294967280 }
  0x61   : > { %6694 = dma.done.wait (%p6060_p9), [#allocation6], 2576  }
  0x62   : > { %6696 = vsyncadd (%p6060_p9), [#allocation6], 4294964720 }
  0x63   : > { %6698 = dma.done.wait (%p6060_p9), [#allocation9], 1552  }
  0x64   : > { %6700 = vsyncadd (%p6060_p9), [#allocation9], 4294965744 }
  0x65   : > { %6702 = dma.done.wait (%p6060_p9), [#allocation12], 4112  }
  0x66   : > { %6704 = vsyncadd (%p6060_p9), [#allocation12], 4294963184 }
  0x67   : > { %6706 = dma.done.wait (%p6060_p9), [#allocation15], 5136  }
  0x68   : > { %6708 = vsyncadd (%p6060_p9), [#allocation15], 4294962160 }
  0x69   : > { %6710 = dma.done.wait (%p6060_p9), [#allocation18], 3088  }
  0x6a   : > { %6712 = vsyncadd (%p6060_p9), [#allocation18], 4294964208 }
  0x6b   : > { %6714 = dma.done.wait (%p6060_p9), [#allocation21], 8208  }
  0x6c   : > { %6716 = vsyncadd (%p6060_p9), [#allocation21], 4294959088 }
  0x6d   : > { %6718 = dma.done.wait (%p6060_p9), [#allocation24], 8192  }
  0x6e   : > { %6720 = vsyncadd (%p6060_p9), [#allocation24], 4294959104 }
  0x6f   : > { %6722 = dma.done.wait (%p6060_p9), [#allocation27], 1024  }
  0x70   : > { %6724 = vsyncadd (%p6060_p9), [#allocation27], 4294966272  ;;  %p1008_p13 = scmp.lt.s32.totalorder %s6923_s7, 1  ;;  %s7399_s24 = sld [smem:[#allocation47_spill]]  ;;  %vm1032_vm0 = vcmask 1041408   ;;  %vm1054_vm3 = vcmask 1046528  }
  0x71   : > { %vm1033_vm1 = vsmask.f32 1280  ;;  %s6763_s4 = smov 8   ;;  %vm1060_vm4 = vsmask.f32 6400  ;;  %s6764_s8 = smov 12  }
  0x72   : > { %s1009_s6 = scalar_select %p1008_p13, %s6923_s7, 1  ;;  %vm7118_vm2 = vmand %vm1032_vm0, %vm1033_vm1  ;;  %vm1037_vm5 = vsmask.f32 7424  ;;  %vm1078_vm6 = vsmask.f32 5376  ;;  %vm1072_vm7 = vcmask 1045504  }
  0x73   : > { %s6765_s2 = smov 4   ;;  %s6766_s28 = smov 20   ;;  %vm1094_vm8 = vsmask.f32 4352  ;;  %vm7361_vm9 = vcmask 1044480   ;;  %vm1104_vm10 = vcmask 31744  }
  0x74   : > { %s5670_s9 = sshll.u32 %s1009_s6, 4  ;;  %s6767_s25 = smov 16   ;;  %vm1107_vm11 = vcmask 64512   ;;  %vm1110_vm12 = vcmask 97280   ;;  %vm1113_vm13 = vcmask 130048   ;;  %vm1116_vm14 = vcmask 162816  }
  0x75   : > { %s6768_s27 = smov 28   ;;  %s6769_s12 = smov 24   ;;  %vm1119_vm15 = vcmask 195584   ;;  %vm1122_vm1 = vcmask 228352  }
  0x76   : > { %s1012_s10 = scalar_lea.vmem %s7399_s24, %s5670_s9  ;;  %s7402_s5 = sld [smem:[#allocation48_spill]] }
  0x77   : > { %v1014_v0 = vld [vmem:[%s1012_s10] sm:$0xff]  ;;  %v1015_v1 = vld [vmem:[%s1012_s10 + $0x8] sm:$0xff]  ;;  %s6770_s26 = smov 64   ;;  %s7403_s0 = sld [smem:[#allocation54_spill]] }
  0x78   : > { %v1016_v2 = vpack.c.bf16 %v1014_v0, %v1014_v0  ;;  %v1017_v3 = vpack.c.bf16 %v1015_v1, %v1015_v1  ;;  %s7410_s9 = sld [smem:[#allocation59_spill]] }
  0x7a   : > { %v1020_v4 = vunpack.c.l.b16 %v1016_v2  ;;  %v1021_v5 = vunpack.c.l.b16 %v1017_v3 }
  0x7c   : > { %v7113_v6 = vpack.c.b16 %v1021_v5, %v1020_v4  ;;  %v5672_v53 = vld [vmem:[%s7402_s5 + $0x8] sm:$0xff]  ;;  %v5671_v54 = vld [vmem:[%s7402_s5] sm:$0xff] }
  0x7d   : > { %1154 = vmatpush.bf16.msra.mxu0 %v5672_v53  ;;  %v5692_v5 = vld [vmem:[#allocation5 + $0x98] sm:$0xff] }
  0x7e   : > { %v1024_v7 = vshrl.u32 %v7113_v6, 16  ;;  %v1027_v8 = vshll.u32 %v7113_v6, 16 }
  0x80   : > { %v1026_v9 = vrot.slane %v1024_v7, 6  ;;  %v1029_v10 = vrot.slane %v1027_v8, 7  ;;  %v5691_v7 = vld [vmem:[#allocation5 + $0x90] sm:$0xff]  ;;  %v5690_v8 = vld [vmem:[#allocation5 + $0x88] sm:$0xff] }
  0x81   : > { %1155 = vmatpush.bf16.msra.mxu0 %v5671_v54  ;;  %v5686_v54 = vld [vmem:[#allocation5 + $0x68] sm:$0xff] }
  0x82   : > { %v1030_v12 = vor.u32 %v1029_v10, %v1026_v9  ;;  %v5689_v9 = vld [vmem:[#allocation5 + $0x80] sm:$0xff]  ;;  %v5680_v10 = vld [vmem:[#allocation5 + $0x38] sm:$0xff] }
  0x83   : > { %1383 = vmatpush.bf16.msra.mxu1 %v5680_v10 }
  0x84   : > { %v7124_v13 = vsel %vm7118_vm2, 0, %v1030_v12  ;;  %v1036_v14 = vsel %vm7118_vm2, %v1030_v12, 0  ;;  %v6152_v12 = vld [vmem:[#allocation2] ss:$0 sm:$0xff] }
  0x85   : > { %v1055_v15 = vrot.slane %v7124_v13, 1  ;;  %v1056_v16 = vrot.slane %v1036_v14, 1  ;;  %v1039_v17 = vshrl.u32 %v7124_v13, 16  ;;  %v1041_v18 = vshll.u32 %v7124_v13, 16  ;;  %1415 = vmatpush.bf16.msrb.mxu0 %v5692_v5  ;;  %v5702_v5 = vld [vmem:[#allocation8 + $0x48] sm:$0xff] }
  0x86   : > { %v1046_v19 = vshll.u32 %v1036_v14, 16  ;;  %v1064_v20 = vshrl.u32 %v1036_v14, 16  ;;  %v1073_v42 = vrot.slane %v7124_v13, 2  ;;  %v1074_v43 = vrot.slane %v1036_v14, 2 }
  0x87   : > { %v1057_v21 = vsel %vm1054_vm3, %v1055_v15, %v1056_v16  ;;  %v1061_v22 = vrot.slane %v1039_v17, 1  ;;  %v1062_v23 = vrot.slane %v1041_v18, 2  ;;  %v1043_v24 = vrot.slane %v1041_v18, 1  ;;  %v5688_v15 = vld [vmem:[#allocation5 + $0x78] sm:$0xff]  ;;  %v5687_v16 = vld [vmem:[#allocation5 + $0x70] sm:$0xff] }
  0x88   : > { %1058 = vrot.lane.b32.xlu0 %v1057_v21, %s6763_s4  ;;  %v1066_v25 = vrot.slane %v1064_v20, 1  ;;  %v1067_v26 = vrot.slane %v1046_v19, 2  ;;  %v1048_v29 = vrot.slane %v1046_v19, 1  ;;  %v1079_v31 = vrot.slane %v1039_v17, 2  ;;  %1397 = vmatpush.bf16.msra.mxu2 %v5688_v15  ;;  %v5677_v21 = vld [vmem:[#allocation5 + $0x20] sm:$0xff]  ;;  %s7412_s4 = sld [smem:[#allocation61_spill]] }
  0x89   : > { %v1063_v27 = vor.u32 %v1062_v23, %v1061_v22  ;;  %v1044_v28 = vor.u32 %v1043_v24, %v1039_v17  ;;  %v1080_v32 = vrot.slane %v1041_v18, 3  ;;  %v1082_v33 = vrot.slane %v1064_v20, 2  ;;  %1416 = vmatpush.bf16.msrb.mxu0 %v5691_v7  ;;  %v5701_v7 = vld [vmem:[#allocation8 + $0x40] sm:$0xff]  ;;  %v5700_v15 = vld [vmem:[#allocation8 + $0x38] sm:$0xff] }
  0x8a   : > { %v1068_v30 = vor.u32 %v1067_v26, %v1066_v25  ;;  %v1095_v35 = vrot.slane %v1039_v17, 3  ;;  %v1096_v36 = vrot.slane %v1041_v18, 4  ;;  %v1083_v37 = vrot.slane %v1046_v19, 3  ;;  %v5678_v18 = vld [vmem:[#allocation5 + $0x28] sm:$0xff]  ;;  %v5676_v25 = vld [vmem:[#allocation5 + $0x18] sm:$0xff] }
  0x8b   : > { %v1049_v38 = vsel %vm1037_vm5, %v1044_v28, %v1048_v29  ;;  %v1098_v39 = vrot.slane %v1064_v20, 3  ;;  %v1099_v40 = vrot.slane %v1046_v19, 4  ;;  %v1081_v41 = vor.u32 %v1080_v32, %v1079_v31  ;;  %v5675_v29 = vld [vmem:[#allocation5 + $0x10] sm:$0xff]  ;;  %v5674_v32 = vld [vmem:[#allocation5 + $0x8] sm:$0xff] }
  0x8c   : > { %v1069_v34 = vsel %vm1060_vm4, %v1063_v27, %v1068_v30  ;;  %v1084_v44 = vor.u32 %v1083_v37, %v1082_v33  ;;  %v1097_v46 = vor.u32 %v1096_v36, %v1095_v35  ;;  %v1075_v48 = vsel %vm1072_vm7, %v1073_v42, %v1074_v43  ;;  %1398 = vmatpush.bf16.msra.mxu2 %v5687_v16 }
  0x8d   : > { %1070 = vrot.lane.b32.xlu1 %v1069_v34, %s6764_s8  ;;  %v1100_v47 = vor.u32 %v1099_v40, %v1098_v39  ;;  %v1089_v49 = vrot.slane %v7124_v13, 3  ;;  %v1090_v50 = vrot.slane %v1036_v14, 3  ;;  %1417 = vmatpush.bf16.msrb.mxu0 %v5690_v8  ;;  %v5679_v14 = vld [vmem:[#allocation5 + $0x30] sm:$0xff] }
  0x8e   : > { %v1085_v45 = vsel %vm1078_vm6, %v1081_v41, %v1084_v44  ;;  %1384 = vmatpush.bf16.msra.mxu1 %v5679_v14  ;;  %s4327_s8 = scalar_lea.hbm %s7412_s4, %s6923_s7 }
  0x8f   : > { %1086 = vrot.lane.b32.xlu2 %v1085_v45, %s6766_s28  ;;  %v1101_v51 = vsel %vm1094_vm8, %v1097_v46, %v1100_v47  ;;  %v1091_v52 = vsel %vm7361_vm9, %v1089_v49, %v1090_v50  ;;  %vm1145_vm9 = vcmask 261120   ;;  %v5673_v45 = vld [vmem:[#allocation5] sm:$0xff]  ;;  %s4331_s22 = sshll.u32 %s4327_s8, 4  ;;  %s4332_s22 = int_to_ptr.hbm [resolvable:$true] %s4331_s22 }
  0x90   : > { %1050 = vrot.lane.b32.xlu0 %v1049_v38, %s6765_s2  ;;  %1399 = vmatpush.bf16.msra.mxu2 %v5686_v54  ;;  %s6659_s1 = sshra.s32 %s4332_s22, 4  ;;  %s6660_s1 = int_to_ptr.hbm [resolvable:$true] %s6659_s1 }
  0x91   : > { %1418 = vmatpush.bf16.msrb.mxu0 %v5689_v9  ;;  %v6153_v9 = vld [vmem:[#allocation7] ss:$0 sm:$0xff]  ;;  %p6666_p3 = scmp.lt.s32.totalorder %s6660_s1, %s7412_s4 }
  0x92   : > { %1385 = vmatpush.bf16.msra.mxu1 %v5678_v18 }
  0x95   : > { %1076 = vrot.lane.b32.xlu1 %v1075_v48, %s6767_s25  ;;  %s7413_s25 = sld [smem:[#allocation60_spill]] }
  0x96   : > { %1386 = vmatpush.bf16.msra.mxu1 %v5677_v21 }
  0x97   : > { %1092 = vrot.lane.b32.xlu2 %v1091_v52, %s6769_s12 }
  0x98   : > { %1102 = vrot.lane.b32.xlu0 %v1101_v51, %s6768_s27 }
  0x9a   : > { %1387 = vmatpush.bf16.msra.mxu1 %v5676_v25  ;;  %v5698_v25 = vld [vmem:[#allocation8 + $0x28] sm:$0xff] }
  0x9e   : > { %1388 = vmatpush.bf16.msra.mxu1 %v5675_v29 }
  0xa2   : > { %1389 = vmatpush.bf16.msra.mxu1 %v5674_v32 }
  0xa6   : > { %1390 = vmatpush.bf16.msra.mxu1 %v5673_v45 }
  0xe9   : > { %v1087_v56 = vpop.permute.xlu2 %1086 }
  0xf1   : > { %v1093_v63 = vpop.permute.xlu2 %1092 }
  0xfa   : > { %v1059_v55 = vpop.permute.xlu0 %1058 }
  0xff   : > { %v1071_v57 = vpop.permute.xlu1 %1070 }
 0x102   : > { %v1051_v58 = vpop.permute.xlu0 %1050 }
 0x103   : > { %v1106_v59 = vsel %vm1104_vm10, %v7124_v13, %v1051_v58  ;;  %v5682_v58 = vld [vmem:[#allocation5 + $0x48] sm:$0xff] }
 0x104   : > { %v1109_v60 = vsel %vm1107_vm11, %v1106_v59, %v1059_v55  ;;  %vm1208_vm11 = vcmask 523264   ;;  %v5685_v55 = vld [vmem:[#allocation5 + $0x60] sm:$0xff] }
 0x105   : > { %v1112_v61 = vsel %vm1110_vm12, %v1109_v60, %v1071_v57  ;;  %1400 = vmatpush.bf16.msra.mxu2 %v5685_v55  ;;  %v5683_v57 = vld [vmem:[#allocation5 + $0x50] sm:$0xff]  ;;  %v5681_v59 = vld [vmem:[#allocation5 + $0x40] sm:$0xff] }
 0x107   : > { %v1077_v62 = vpop.permute.xlu1 %1076 }
 0x108   : > { %v1115_v0 = vsel %vm1113_vm13, %v1112_v61, %v1077_v62 }
 0x109   : > { %v1118_v1 = vsel %vm1116_vm14, %v1115_v0, %v1087_v56  ;;  %v5684_v56 = vld [vmem:[#allocation5 + $0x58] sm:$0xff] }
 0x10a   : > { %v1121_v2 = vsel %vm1119_vm15, %v1118_v1, %v1093_v63  ;;  %v1103_v3 = vpop.permute.xlu0 %1102  ;;  %1401 = vmatpush.bf16.msra.mxu2 %v5684_v56 }
 0x10b   : > { %v1124_v4 = vsel %vm1122_vm1, %v1121_v2, %v1103_v3  ;;  %v5704_v3 = vld [vmem:[#allocation8 + $0x58] sm:$0xff] }
 0x10c   : > { %4587 = vmatmul.msk.bf16.vlgmr.msra.gmra.mxu0 %vm1145_vm9, %v1124_v4  ;;  %vm1172_vm9 = vcmask 1040384   ;;  %1591 = vmatpush.bf16.msra.mxu3 %v5704_v3  ;;  %v5703_v4 = vld [vmem:[#allocation8 + $0x50] sm:$0xff] }
 0x10d   : > { %1573 = vmatpush.bf16.msra.mxu0 %v5700_v15  ;;  %vm7218_vm13 = vmneg %vm1172_vm9 }
 0x10e   : > { %1402 = vmatpush.bf16.msra.mxu2 %v5683_v57  ;;  %v6155_v57 = vld [vmem:[#allocation10] ss:$0 sm:$0xff] }
 0x110   : > { %1592 = vmatpush.bf16.msra.mxu3 %v5703_v4 }
 0x112   : > { %1403 = vmatpush.bf16.msra.mxu2 %v5682_v58 }
 0x114   : > { %1593 = vmatpush.bf16.msra.mxu3 %v5702_v5 }
 0x116   : > { %1404 = vmatpush.bf16.msra.mxu2 %v5681_v59 }
 0x118   : > { %1594 = vmatpush.bf16.msra.mxu3 %v5701_v7 }
 0x189   : > { %v1157_v13 = vpop.f32.mrf.mxu0 }
 0x18a   : > { %v1158_v17 = vadd.f32 %v6152_v12, %v1157_v13 }
 0x18c   : > { %v1162_v19 = vmax.f32 %v1158_v17, 0.0  ;;  %v1603_v17 = vld [vmem:[%s7403_s0] sm:$0x3]  ;;  %s7411_s0 = sld [smem:[#allocation40_spill]] }
 0x18e   : > { %v1164_v23 = vpack.c.bf16 %v1162_v19, %v1162_v19  ;;  %v5699_v19 = vld [vmem:[#allocation8 + $0x30] sm:$0xff] }
 0x18f   : > { %1574 = vmatpush.bf16.msra.mxu0 %v5699_v19 }
 0x190   : > { %v1168_v27 = vunpack.c.l.b16 %v1164_v23 }
 0x191   : > { %v1159_v20 = vpop.f32.mrf.mxu0 }
 0x192   : > { %v1160_v22 = vadd.f32 %v6152_v12, %v1159_v20  ;;  %v1612_v20 = vsel %vm1032_vm0, %v1603_v17, 0  ;;  %vm1444_vm0 = vsmask.f32 256  ;;  %v5712_v17 = vld [vmem:[#allocation13 + $0x38] sm:$0xff]  ;;  %s1006_s3 = sand.u32 1, %s7411_s0  }
 0x193   : > { %1621 = vmatpush.bf16.msrb.mxu1 %v1612_v20  ;;  %1575 = vmatpush.bf16.msra.mxu0 %v5698_v25  ;;  %vm7166_vm12 = vmand %vm1172_vm9, %vm1444_vm0  ;;  %s1007_s12 = scalar_lea.vmem [#allocation28], %s1006_s3  ;;  %s4319_s30 = scalar_lea.sflag [#allocation4], %s1006_s3 }
 0x194   : > { %v1163_v24 = vmax.f32 %v1160_v22, 0.0  ;;  %1977 = vmatpush.bf16.msrb.mxu2 %v5712_v17  ;;  %v5722_v17 = vld [vmem:[#allocation13 + $0x88] sm:$0xff]  ;;  %s4329_s29 = sshll.u32 %s1007_s12, 4  ;;  %s4330_s29 = int_to_ptr.vmem [resolvable:$true] %s4329_s29 }
 0x196   : > { %v1165_v26 = vpack.c.bf16 %v1163_v24, %v1163_v24 }
 0x198   : > { %v1169_v28 = vunpack.c.l.b16 %v1165_v26 }
 0x19a   : > { %v1170_v30 = vpack.c.b16 %v1169_v28, %v1168_v27 }
 0x19c   : > { %v1171_v31 = vrot.slane %v1170_v30, 7  ;;  %v5697_v30 = vld [vmem:[#allocation8 + $0x20] sm:$0xff] }
 0x19d   : > { %1576 = vmatpush.bf16.msra.mxu0 %v5697_v30 }
 0x19e   : > { %v1175_v33 = vsel %vm1172_vm9, 0, %v1171_v31  ;;  %v1176_v34 = vsel %vm1172_vm9, %v1171_v31, 0 }
 0x19f   : > { %v1205_v35 = vrot.slane %v1175_v33, 2  ;;  %v1206_v36 = vrot.slane %v1176_v34, 2  ;;  %v1177_v37 = vshrl.u32 %v1175_v33, 16  ;;  %v1179_v38 = vshll.u32 %v1175_v33, 16 }
 0x1a0   : > { %v1183_v39 = vshll.u32 %v1176_v34, 16  ;;  %v1197_v40 = vshrl.u32 %v1176_v34, 16  ;;  %v1191_v62 = vrot.slane %v1175_v33, 1  ;;  %v1192_v63 = vrot.slane %v1176_v34, 1  ;;  %v5696_v34 = vld [vmem:[#allocation8 + $0x18] sm:$0xff] }
 0x1a1   : > { %v1207_v41 = vsel %vm1072_vm7, %v1205_v35, %v1206_v36  ;;  %v1194_v42 = vrot.slane %v1177_v37, 1  ;;  %v1195_v43 = vrot.slane %v1179_v38, 2  ;;  %v1181_v44 = vrot.slane %v1179_v38, 1  ;;  %1577 = vmatpush.bf16.msra.mxu0 %v5696_v34  ;;  %v5938_v38 = vld [vmem:[#allocation26 + $0x28] sm:$0xff] }
 0x1a2   : > { %4668 = vmatmul.msk.bf16.vlgmr.msrb.gmra.mxu0 %vm1208_vm11, %v1207_v41  ;;  %v1199_v46 = vrot.slane %v1197_v40, 1  ;;  %v1200_v47 = vrot.slane %v1183_v39, 2  ;;  %v1185_v50 = vrot.slane %v1183_v39, 1  ;;  %v1193_v1 = vsel %vm1054_vm3, %v1191_v62, %v1192_v63  ;;  %v6154_v62 = vld [vmem:[#allocation11] ss:$0 sm:$0xff] }
 0x1a3   : > { %v1196_v48 = vor.u32 %v1195_v43, %v1194_v42  ;;  %v1182_v49 = vor.u32 %v1181_v44, %v1177_v37  ;;  %v5695_v37 = vld [vmem:[#allocation8 + $0x10] sm:$0xff]  ;;  %v5694_v42 = vld [vmem:[#allocation8 + $0x8] sm:$0xff] }
 0x1a4   : > { %v1201_v51 = vor.u32 %v1200_v47, %v1199_v46 }
 0x1a5   : > { %v1186_v52 = vsel %vm1037_vm5, %v1182_v49, %v1185_v50  ;;  %1578 = vmatpush.bf16.msra.mxu0 %v5695_v37 }
 0x1a6   : > { %v1202_v53 = vsel %vm1060_vm4, %v1196_v48, %v1201_v51  ;;  %1187 = vrot.lane.b32.xlu2 %v1186_v52, %s6770_s26  ;;  %v5693_v48 = vld [vmem:[#allocation8] sm:$0xff] }
 0x1a7   : > { %1203 = vrot.lane.b32.xlu1 %v1202_v53, %s6770_s26 }
 0x1a9   : > { %1579 = vmatpush.bf16.msra.mxu0 %v5694_v42 }
 0x1ad   : > { %1580 = vmatpush.bf16.msra.mxu0 %v5693_v48 }
 0x200   : > { %v1188_v60 = vpop.permute.xlu2 %1187 }
 0x201   : > { %v1210_v61 = vsel %vm1208_vm11, %v1175_v33, %v1188_v60 }
 0x202   : > { %1391 = vmatmul.bf16.vlgmr.msra.gmra.mxu1 %v1210_v61 }
 0x212   : > { %4718 = vmatmul.msk.bf16.vlgmr.msrb.gmra.mxu1 %vm1104_vm10, %v7113_v6  ;;  %vm7406_vm10 = vcmask 1044480  }
 0x219   : > { %v1204_v0 = vpop.permute.xlu1 %1203 }
 0x21a   : > { %v1214_v2 = vsel %vm1208_vm11, %v1193_v1, %v1204_v0 }
 0x21b   : > { %1405 = vmatmul.bf16.vlgmr.msra.gmra.mxu2 %v1214_v2 }
 0x21f   : > { %v1420_v12 = vpop.f32.mrf.mxu0 }
 0x227   : > { %v1422_v26 = vpop.f32.mrf.mxu0 }
 0x27f   : > { %v1392_v8 = vpop.f32.mrf.mxu1 }
 0x280   : > { %v1393_v10 = vadd.f32 %v6153_v9, %v1392_v8 }
 0x287   : > { %v1394_v16 = vpop.f32.mrf.mxu1 }
 0x288   : > { %v1395_v21 = vadd.f32 %v6153_v9, %v1394_v16  ;;  %v5719_v16 = vld [vmem:[#allocation13 + $0x70] sm:$0xff] }
 0x28f   : > { %v1623_v58 = vpop.f32.mrf.mxu1 }
 0x290   : > { %v1624_v0 = vadd.f32 %v6154_v62, %v1623_v58 }
 0x297   : > { %v1625_v5 = vpop.f32.mrf.mxu1 }
 0x298   : > { %v1626_v9 = vadd.f32 %v6154_v62, %v1625_v5  ;;  %v5713_v62 = vld [vmem:[#allocation13 + $0x40] sm:$0xff] }
 0x299   : > { %v5709_v5 = vld [vmem:[#allocation13 + $0x20] sm:$0xff] }
 0x29e   : > { %v1406_v13 = vpop.f32.mrf.mxu2 }
 0x29f   : > { %v1407_v14 = vadd.f32 %v1406_v13, %v1393_v10 }
 0x2a1   : > { %v1421_v18 = vadd.f32 %v1420_v12, %v1407_v14  ;;  %v5720_v14 = vld [vmem:[#allocation13 + $0x78] sm:$0xff] }
 0x2a2   : > { %1991 = vmatpush.bf16.msrb.mxu3 %v5720_v14  ;;  %v5723_v14 = vld [vmem:[#allocation13 + $0x90] sm:$0xff] }
 0x2a3   : > { %v1425_v23 = vmax.f32 %v1421_v18, 0.0  ;;  %v5728_v18 = vld [vmem:[#allocation13 + $0xb8] sm:$0xff] }
 0x2a4   : > { %2005 = vmatpush.bf16.msrb.mxu0 %v5728_v18  ;;  %v5732_v18 = vld [vmem:[#allocation13 + $0xd8] sm:$0xff] }
 0x2a5   : > { %v1427_v28 = vpack.c.bf16 %v1425_v23, %v1425_v23 }
 0x2a6   : > { %v1408_v22 = vpop.f32.mrf.mxu2  ;;  %1992 = vmatpush.bf16.msrb.mxu3 %v5719_v16  ;;  %v5706_v16 = vld [vmem:[#allocation13 + $0x8] sm:$0xff] }
 0x2a7   : > { %v1409_v24 = vadd.f32 %v1408_v22, %v1395_v21  ;;  %v1431_v32 = vunpack.c.l.b16 %v1427_v28  ;;  %v5711_v21 = vld [vmem:[#allocation13 + $0x30] sm:$0xff] }
 0x2a8   : > { %v5727_v22 = vld [vmem:[#allocation13 + $0xb0] sm:$0xff]  ;;  %1978 = vmatpush.bf16.msrb.mxu2 %v5711_v21 }
 0x2a9   : > { %v1423_v27 = vadd.f32 %v1422_v26, %v1409_v24  ;;  %v5718_v24 = vld [vmem:[#allocation13 + $0x68] sm:$0xff]  ;;  %2006 = vmatpush.bf16.msrb.mxu0 %v5727_v22  ;;  %v5731_v21 = vld [vmem:[#allocation13 + $0xd0] sm:$0xff] }
 0x2aa   : > { %1993 = vmatpush.bf16.msrb.mxu3 %v5718_v24  ;;  %v5730_v22 = vld [vmem:[#allocation13 + $0xc8] sm:$0xff] }
 0x2ab   : > { %v1426_v29 = vmax.f32 %v1423_v27, 0.0 }
 0x2ad   : > { %v1428_v31 = vpack.c.bf16 %v1426_v29, %v1426_v29  ;;  %v5717_v29 = vld [vmem:[#allocation13 + $0x60] sm:$0xff] }
 0x2ae   : > { %1994 = vmatpush.bf16.msrb.mxu3 %v5717_v29 }
 0x2af   : > { %v1432_v33 = vunpack.c.l.b16 %v1428_v31 }
 0x2b1   : > { %v1433_v35 = vpack.c.b16 %v1432_v33, %v1431_v32  ;;  %v5716_v33 = vld [vmem:[#allocation13 + $0x58] sm:$0xff] }
 0x2b2   : > { %1995 = vmatpush.bf16.msrb.mxu3 %v5716_v33 }
 0x2b3   : > { %v1435_v36 = vshrl.u32 %v1433_v35, 16  ;;  %v1438_v39 = vshll.u32 %v1433_v35, 16 }
 0x2b5   : > { %v1437_v6 = vrot.slane %v1435_v36, 7 }
 0x2b7   : > { %v1440_v40 = vor.u32 %v1438_v39, %v1437_v6  ;;  %v1447_v41 = vsel %vm7166_vm12, %v1437_v6, 0 }
 0x2b8   : > { %v1465_v45 = vrot.slane %v1447_v41, 1  ;;  %v1456_v47 = vshll.u32 %v1447_v41, 16 }
 0x2b9   : > { %v1446_v43 = vsel %vm7166_vm12, 0, %v1440_v40 }
 0x2ba   : > { %v1464_v44 = vrot.slane %v1446_v43, 1  ;;  %v1451_v46 = vshll.u32 %v1446_v43, 16  ;;  %v1449_v50 = vshrl.u32 %v1446_v43, 16  ;;  %v1458_v53 = vrot.slane %v1456_v47, 1 }
 0x2bc   : > { %v1466_v49 = vsel %vm1054_vm3, %v1464_v44, %v1465_v45  ;;  %v1453_v51 = vrot.slane %v1451_v46, 1  ;;  %v5715_v46 = vld [vmem:[#allocation13 + $0x50] sm:$0xff] }
 0x2bd   : > { %4717 = vmatmul.msk.bf16.vlgmr.msra.gmra.mxu3 %vm1208_vm11, %v1466_v49 }
 0x2be   : > { %v1454_v52 = vor.u32 %v1453_v51, %v1449_v50  ;;  %1996 = vmatpush.bf16.msrb.mxu3 %v5715_v46  ;;  %v5742_v46 = vld [vmem:[#allocation16 + $0x28] sm:$0xff] }
 0x2c0   : > { %v1459_v54 = vsel %vm1037_vm5, %v1454_v52, %v1458_v53 }
 0x2c1   : > { %1460 = vrot.lane.b32.xlu0 %v1459_v54, %s6770_s26 }
 0x333   : > { %v1461_v55 = vpop.permute.xlu0 %1460 }
 0x334   : > { %v1468_v56 = vsel %vm1208_vm11, %v1446_v43, %v1461_v55 }
 0x335   : > { %1581 = vmatmul.bf16.vlgmr.msra.gmra.mxu0 %v1468_v56 }
 0x340   : > { %v1596_v59 = vpop.f32.mrf.mxu3 }
 0x348   : > { %v1598_v4 = vpop.f32.mrf.mxu3 }
 0x3b2   : > { %v1582_v60 = vpop.f32.mrf.mxu0 }
 0x3b3   : > { %v1583_v61 = vadd.f32 %v6155_v57, %v1582_v60 }
 0x3b5   : > { %v1597_v63 = vadd.f32 %v1596_v59, %v1583_v61 }
 0x3b7   : > { %v1601_v1 = vmax.f32 %v1597_v63, 0.0 }
 0x3b9   : > { %v1628_v7 = vadd.f32 %v1624_v0, %v1601_v1 }
 0x3ba   : > { %v1584_v2 = vpop.f32.mrf.mxu0 }
 0x3bb   : > { %v1585_v3 = vadd.f32 %v6155_v57, %v1584_v2  ;;  %v1630_v12 = vpack.c.bf16 %v1628_v7, %v1628_v7  ;;  %v5714_v57 = vld [vmem:[#allocation13 + $0x48] sm:$0xff]  ;;  %v5725_v7 = vld [vmem:[#allocation13 + $0xa0] sm:$0xff] }
 0x3bc   : > { %1997 = vmatpush.bf16.msrb.mxu3 %v5714_v57  ;;  %v5710_v2 = vld [vmem:[#allocation13 + $0x28] sm:$0xff] }
 0x3bd   : > { %v1599_v8 = vadd.f32 %v1598_v4, %v1585_v3  ;;  %v1634_v19 = vunpack.c.l.b16 %v1630_v12  ;;  %v5726_v3 = vld [vmem:[#allocation13 + $0xa8] sm:$0xff]  ;;  %v5736_v4 = vld [vmem:[#allocation13 + $0xf8] sm:$0xff]  ;;  %1979 = vmatpush.bf16.msrb.mxu2 %v5710_v2 }
 0x3be   : > { %2007 = vmatpush.bf16.msrb.mxu0 %v5726_v3  ;;  %2019 = vmatpush.bf16.msra.mxu1 %v5736_v4  ;;  %v5734_v12 = vld [vmem:[#allocation13 + $0xe8] sm:$0xff]  ;;  %v5755_v2 = vld [vmem:[#allocation16 + $0x90] sm:$0xff]  ;;  %v5764_v3 = vld [vmem:[#allocation16 + $0xd8] sm:$0xff] }
 0x3bf   : > { %v1602_v10 = vmax.f32 %v1599_v8, 0.0  ;;  %v5735_v8 = vld [vmem:[#allocation13 + $0xf0] sm:$0xff] }
 0x3c0   : > { %1998 = vmatpush.bf16.msrb.mxu3 %v5713_v62  ;;  %v5750_v57 = vld [vmem:[#allocation16 + $0x68] sm:$0xff]  ;;  %v5756_v62 = vld [vmem:[#allocation16 + $0x98] sm:$0xff] }
 0x3c1   : > { %v1629_v13 = vadd.f32 %v1626_v9, %v1602_v10  ;;  %1980 = vmatpush.bf16.msrb.mxu2 %v5709_v5  ;;  %v5708_v9 = vld [vmem:[#allocation13 + $0x18] sm:$0xff]  ;;  %v5774_v4 = vld [vmem:[#allocation16 + $0x128] sm:$0xff] }
 0x3c2   : > { %2008 = vmatpush.bf16.msrb.mxu0 %v5725_v7  ;;  %v5724_v10 = vld [vmem:[#allocation13 + $0x98] sm:$0xff]  ;;  %2020 = vmatpush.bf16.msra.mxu1 %v5735_v8  ;;  %v5754_v7 = vld [vmem:[#allocation16 + $0x88] sm:$0xff] }
 0x3c3   : > { %v1631_v15 = vpack.c.bf16 %v1629_v13, %v1629_v13  ;;  %v5707_v13 = vld [vmem:[#allocation13 + $0x10] sm:$0xff] }
 0x3c4   : > { %v5747_v5 = vld [vmem:[#allocation16 + $0x50] sm:$0xff] }
 0x3c5   : > { %v1635_v20 = vunpack.c.l.b16 %v1631_v15  ;;  %1981 = vmatpush.bf16.msrb.mxu2 %v5708_v9  ;;  %v5733_v15 = vld [vmem:[#allocation13 + $0xe0] sm:$0xff]  ;;  %v5763_v8 = vld [vmem:[#allocation16 + $0xd0] sm:$0xff] }
 0x3c6   : > { %2009 = vmatpush.bf16.msrb.mxu0 %v5724_v10  ;;  %2021 = vmatpush.bf16.msra.mxu1 %v5734_v12  ;;  %v5773_v9 = vld [vmem:[#allocation16 + $0x120] sm:$0xff]  ;;  %v6156_v10 = vld [vmem:[#allocation14] ss:$0 sm:$0xff]  ;;  %v5746_v12 = vld [vmem:[#allocation16 + $0x48] sm:$0xff] }
 0x3c7   : > { %v7179_v23 = vpack.c.b16 %v1635_v20, %v1634_v19  ;;  %v5705_v19 = vld [vmem:[#allocation13] sm:$0xff] }
 0x3c8   : > { %v5721_v20 = vld [vmem:[#allocation13 + $0x80] sm:$0xff] }
 0x3c9   : > { %v1638_v25 = vshrl.u32 %v7179_v23, 16  ;;  %v1641_v26 = vshll.u32 %v7179_v23, 16  ;;  %1982 = vmatpush.bf16.msrb.mxu2 %v5707_v13  ;;  %v5753_v13 = vld [vmem:[#allocation16 + $0x80] sm:$0xff] }
 0x3ca   : > { %2010 = vmatpush.bf16.msrb.mxu0 %v5723_v14  ;;  %2022 = vmatpush.bf16.msra.mxu1 %v5733_v15  ;;  %v5762_v14 = vld [vmem:[#allocation16 + $0xc8] sm:$0xff]  ;;  %v5772_v15 = vld [vmem:[#allocation16 + $0x118] sm:$0xff] }
 0x3cb   : > { %v1640_v27 = vrot.slane %v1638_v25, 6  ;;  %v1643_v28 = vrot.slane %v1641_v26, 7  ;;  %v5729_v26 = vld [vmem:[#allocation13 + $0xc0] sm:$0xff] }
 0x3cd   : > { %v1644_v30 = vor.u32 %v1643_v28, %v1640_v27  ;;  %1983 = vmatpush.bf16.msrb.mxu2 %v5706_v16 }
 0x3ce   : > { %2011 = vmatpush.bf16.msrb.mxu0 %v5722_v17  ;;  %2023 = vmatpush.bf16.msra.mxu1 %v5732_v18 }
 0x3cf   : > { %v7185_v31 = vsel %vm7118_vm2, 0, %v1644_v30  ;;  %v7189_v32 = vsel %vm7118_vm2, %v1644_v30, 0 }
 0x3d0   : > { %v1649_v34 = vshrl.u32 %v7185_v31, 16  ;;  %v1651_v35 = vshll.u32 %v7185_v31, 16  ;;  %v1656_v36 = vshll.u32 %v7189_v32, 16  ;;  %v1670_v37 = vshrl.u32 %v7189_v32, 16 }
 0x3d1   : > { %1984 = vmatpush.bf16.msrb.mxu2 %v5705_v19  ;;  %v1664_v24 = vrot.slane %v7185_v31, 1  ;;  %v1665_v25 = vrot.slane %v7189_v32, 1  ;;  %v1678_v30 = vrot.slane %v7185_v31, 2  ;;  %v1679_v33 = vrot.slane %v7189_v32, 2 }
 0x3d2   : > { %v1681_v6 = vrot.slane %v1649_v34, 2  ;;  %v1682_v39 = vrot.slane %v1651_v35, 3  ;;  %v1684_v40 = vrot.slane %v1670_v37, 2  ;;  %v1685_v41 = vrot.slane %v1656_v36, 3  ;;  %2012 = vmatpush.bf16.msrb.mxu0 %v5721_v20  ;;  %2024 = vmatpush.bf16.msra.mxu1 %v5731_v21  ;;  %v5745_v20 = vld [vmem:[#allocation16 + $0x40] sm:$0xff] }
 0x3d3   : > { %v1667_v42 = vrot.slane %v1649_v34, 1  ;;  %v1668_v43 = vrot.slane %v1651_v35, 2  ;;  %v1672_v44 = vrot.slane %v1670_v37, 1  ;;  %v1673_v45 = vrot.slane %v1656_v36, 2 }
 0x3d4   : > { %v1683_v47 = vor.u32 %v1682_v39, %v1681_v6  ;;  %v1686_v48 = vor.u32 %v1685_v41, %v1684_v40  ;;  %v1653_v49 = vrot.slane %v1651_v35, 1  ;;  %v1658_v54 = vrot.slane %v1656_v36, 1 }
 0x3d5   : > { %v1669_v50 = vor.u32 %v1668_v43, %v1667_v42  ;;  %v1674_v51 = vor.u32 %v1673_v45, %v1672_v44  ;;  %v1693_v56 = vrot.slane %v1649_v34, 3  ;;  %v1694_v59 = vrot.slane %v1651_v35, 4  ;;  %v5744_v44 = vld [vmem:[#allocation16 + $0x38] sm:$0xff]  ;;  %v5743_v45 = vld [vmem:[#allocation16 + $0x30] sm:$0xff] }
 0x3d6   : > { %v1687_v52 = vsel %vm1078_vm6, %v1683_v47, %v1686_v48  ;;  %v1654_v53 = vor.u32 %v1653_v49, %v1649_v34  ;;  %v1696_v60 = vrot.slane %v1670_v37, 3  ;;  %v1697_v61 = vrot.slane %v1656_v36, 4  ;;  %2025 = vmatpush.bf16.msra.mxu1 %v5730_v22  ;;  %2402 = vmatpush.bf16.msra.mxu2 %v5744_v44  ;;  %v5741_v47 = vld [vmem:[#allocation16 + $0x20] sm:$0xff]  ;;  %v5740_v48 = vld [vmem:[#allocation16 + $0x18] sm:$0xff] }
 0x3d7   : > { %1688 = vrot.lane.b32.xlu0 %v1687_v52, %s6770_s26  ;;  %v1675_v55 = vsel %vm1060_vm4, %v1669_v50, %v1674_v51  ;;  %v1695_v63 = vor.u32 %v1694_v59, %v1693_v56  ;;  %v1666_v28 = vsel %vm1054_vm3, %v1664_v24, %v1665_v25  ;;  %v1680_v34 = vsel %vm1072_vm7, %v1678_v30, %v1679_v33  ;;  %v5760_v49 = vld [vmem:[#allocation16 + $0xb8] sm:$0xff]  ;;  %v5759_v50 = vld [vmem:[#allocation16 + $0xb0] sm:$0xff]  ;;  %v5738_v52 = vld [vmem:[#allocation16 + $0x8] sm:$0xff] }
 0x3d8   : > { %1676 = vrot.lane.b32.xlu2 %v1675_v55, %s6770_s26  ;;  %v1659_v58 = vsel %vm1037_vm5, %v1654_v53, %v1658_v54  ;;  %v1698_v0 = vor.u32 %v1697_v61, %v1696_v60  ;;  %v1690_v39 = vrot.slane %v7185_v31, 3  ;;  %v1691_v40 = vrot.slane %v7189_v32, 3  ;;  %2430 = vmatpush.bf16.msra.mxu0 %v5760_v49  ;;  %v5752_v32 = vld [vmem:[#allocation16 + $0x78] sm:$0xff]  ;;  %v5751_v53 = vld [vmem:[#allocation16 + $0x70] sm:$0xff]  ;;  %v5758_v54 = vld [vmem:[#allocation16 + $0xa8] sm:$0xff] }
 0x3d9   : > { %1660 = vrot.lane.b32.xlu1 %v1659_v58, %s6770_s26  ;;  %v5768_v51 = vld [vmem:[#allocation16 + $0xf8] sm:$0xff]  ;;  %2416 = vmatpush.bf16.msra.mxu3 %v5752_v32  ;;  %v5767_v55 = vld [vmem:[#allocation16 + $0xf0] sm:$0xff]  ;;  %v5737_v56 = vld [vmem:[#allocation16] sm:$0xff] }
 0x3da   : > { %v1699_v1 = vsel %vm1094_vm8, %v1695_v63, %v1698_v0  ;;  %2026 = vmatpush.bf16.msra.mxu1 %v5729_v26  ;;  %v1692_v41 = vsel %vm7406_vm10, %v1690_v39, %v1691_v40  ;;  %2403 = vmatpush.bf16.msra.mxu2 %v5743_v45  ;;  %v5757_v58 = vld [vmem:[#allocation16 + $0xa0] sm:$0xff]  ;;  %v5766_v59 = vld [vmem:[#allocation16 + $0xe8] sm:$0xff]  ;;  %v5776_v60 = vld [vmem:[#allocation16 + $0x138] sm:$0xff] }
 0x3db   : > { %v5749_v61 = vld [vmem:[#allocation16 + $0x60] sm:$0xff]  ;;  %v5775_v0 = vld [vmem:[#allocation16 + $0x130] sm:$0xff] }
 0x3dc   : > { %2431 = vmatpush.bf16.msra.mxu0 %v5759_v50  ;;  %v5765_v63 = vld [vmem:[#allocation16 + $0xe0] sm:$0xff]  ;;  %v5771_v24 = vld [vmem:[#allocation16 + $0x110] sm:$0xff] }
 0x3dd   : > { %2417 = vmatpush.bf16.msra.mxu3 %v5751_v53  ;;  %v5761_v22 = vld [vmem:[#allocation16 + $0xc0] sm:$0xff] }
 0x3de   : > { %2404 = vmatpush.bf16.msra.mxu2 %v5742_v46  ;;  %2444 = vmatpush.bf16.msrb.mxu1 %v5768_v51 }
 0x3e0   : > { %2432 = vmatpush.bf16.msra.mxu0 %v5758_v54  ;;  %v5803_v54 = vld [vmem:[%s7337_s15 + $0x10] sm:$0xff] }
 0x3e1   : > { %1700 = vrot.lane.b32.xlu1 %v1699_v1, %s6770_s26  ;;  %2418 = vmatpush.bf16.msra.mxu3 %v5750_v57  ;;  %v5748_v1 = vld [vmem:[#allocation16 + $0x58] sm:$0xff]  ;;  %s6661_s26 = scalar_lea.hbm %s6660_s1, 1 }
 0x3e2   : > { %2405 = vmatpush.bf16.msra.mxu2 %v5741_v47  ;;  %2445 = vmatpush.bf16.msrb.mxu1 %v5767_v55  ;;  %p6662_p0 = scmp.ne.s32.totalorder %s6660_s1, %s6661_s26 }
 0x3e4   : > { %2433 = vmatpush.bf16.msra.mxu0 %v5757_v58  ;;  %p6663_p1 = pnand %p6662_p0, %p6940_p5 }
 0x3e5   : > { %2419 = vmatpush.bf16.msra.mxu3 %v5749_v61 }
 0x3e6   : > { %2406 = vmatpush.bf16.msra.mxu2 %v5740_v48  ;;  %2446 = vmatpush.bf16.msrb.mxu1 %v5766_v59  ;;  %v5804_v48 = vld [vmem:[%s7337_s15 + $0x18] sm:$0xff]  ;;  %p6664_p2 = pneg %p6663_p1 }
 0x3e8   : > { %2434 = vmatpush.bf16.msra.mxu0 %v5756_v62 }
 0x3e9   : > { %2420 = vmatpush.bf16.msra.mxu3 %v5748_v1 }
 0x3ea   : > { %2447 = vmatpush.bf16.msrb.mxu1 %v5765_v63 }
 0x3ec   : > { %2435 = vmatpush.bf16.msra.mxu0 %v5755_v2  ;;  %v5802_v2 = vld [vmem:[%s7337_s15 + $0x8] sm:$0xff] }
 0x3ed   : > { %2421 = vmatpush.bf16.msra.mxu3 %v5747_v5 }
 0x3ee   : > { %2448 = vmatpush.bf16.msrb.mxu1 %v5764_v3 }
 0x3f0   : > { %2436 = vmatpush.bf16.msra.mxu0 %v5754_v7  ;;  %v5801_v7 = vld [vmem:[%s7337_s15] sm:$0xff] }
 0x3f1   : > { %2422 = vmatpush.bf16.msra.mxu3 %v5746_v12  ;;  %v5784_v12 = vld [vmem:[#allocation19 + $0x38] sm:$0xff] }
 0x3f2   : > { %2449 = vmatpush.bf16.msrb.mxu1 %v5763_v8 }
 0x3f4   : > { %2437 = vmatpush.bf16.msra.mxu0 %v5753_v13  ;;  %v5800_v13 = vld [vmem:[#allocation19 + $0xb8] sm:$0xff] }
 0x3f5   : > { %2423 = vmatpush.bf16.msra.mxu3 %v5745_v20  ;;  %v5781_v20 = vld [vmem:[#allocation19 + $0x20] sm:$0xff] }
 0x3f6   : > { %2450 = vmatpush.bf16.msrb.mxu1 %v5762_v14  ;;  %v5783_v14 = vld [vmem:[#allocation19 + $0x30] sm:$0xff] }
 0x3fa   : > { %2451 = vmatpush.bf16.msrb.mxu1 %v5761_v22  ;;  %v5780_v22 = vld [vmem:[#allocation19 + $0x18] sm:$0xff] }
 0x432   : > { %v1677_v27 = vpop.permute.xlu2 %1676 }
 0x433   : > { %v1707_v29 = vsel %vm1208_vm11, %v1666_v28, %v1677_v27  ;;  %v5770_v27 = vld [vmem:[#allocation16 + $0x108] sm:$0xff] }
 0x434   : > { %1999 = vmatmul.bf16.vlgmr.msrb.gmra.mxu3 %v1707_v29 }
 0x435   : > { %2707 = vmatpush.bf16.msrb.mxu3 %v5784_v12 }
 0x439   : > { %2708 = vmatpush.bf16.msrb.mxu3 %v5783_v14 }
 0x449   : > { %v1689_v35 = vpop.permute.xlu0 %1688 }
 0x44a   : > { %v1711_v36 = vsel %vm1208_vm11, %v1680_v34, %v1689_v35  ;;  %v5769_v35 = vld [vmem:[#allocation16 + $0x100] sm:$0xff] }
 0x44b   : > { %v1661_v37 = vpop.permute.xlu1 %1660  ;;  %2013 = vmatmul.bf16.vlgmr.msrb.gmra.mxu0 %v1711_v36 }
 0x44c   : > { %v1703_v6 = vsel %vm1208_vm11, %v7185_v31, %v1661_v37  ;;  %v5739_v31 = vld [vmem:[#allocation16 + $0x10] sm:$0xff] }
 0x44d   : > { %1985 = vmatmul.bf16.vlgmr.msrb.gmra.mxu2 %v1703_v6 }
 0x44e   : > { %2407 = vmatpush.bf16.msra.mxu2 %v5739_v31 }
 0x452   : > { %2408 = vmatpush.bf16.msra.mxu2 %v5738_v52 }
 0x453   : > { %v1701_v42 = vpop.permute.xlu1 %1700 }
 0x454   : > { %v1715_v43 = vsel %vm1208_vm11, %v1692_v41, %v1701_v42 }
 0x455   : > { %2027 = vmatmul.bf16.vlgmr.msra.gmra.mxu1 %v1715_v43 }
 0x456   : > { %2409 = vmatpush.bf16.msra.mxu2 %v5737_v56  ;;  %2735 = vmatpush.bf16.msra.mxu1 %v5800_v13 }
 0x45a   : > { %2458 = vmatpush.bf16.msrb.mxu2 %v5776_v60 }
 0x45e   : > { %2459 = vmatpush.bf16.msrb.mxu2 %v5775_v0 }
 0x462   : > { %2460 = vmatpush.bf16.msrb.mxu2 %v5774_v4 }
 0x466   : > { %2461 = vmatpush.bf16.msrb.mxu2 %v5773_v9 }
 0x46a   : > { %2462 = vmatpush.bf16.msrb.mxu2 %v5772_v15  ;;  %v5792_v15 = vld [vmem:[#allocation19 + $0x78] sm:$0xff] }
 0x46b   : > { %2721 = vmatpush.bf16.msrb.mxu0 %v5792_v15 }
 0x46e   : > { %2463 = vmatpush.bf16.msrb.mxu2 %v5771_v24 }
 0x472   : > { %2464 = vmatpush.bf16.msrb.mxu2 %v5770_v27  ;;  %v6157_v27 = vld [vmem:[#allocation17] ss:$0 sm:$0xff] }
 0x476   : > { %2465 = vmatpush.bf16.msrb.mxu2 %v5769_v35  ;;  %v5778_v35 = vld [vmem:[#allocation19 + $0x8] sm:$0xff] }
 0x4b7   : > { %v2000_v16 = vpop.f32.mrf.mxu3 }
 0x4bf   : > { %v2002_v33 = vpop.f32.mrf.mxu3 }
 0x4c8   : > { %v2014_v19 = vpop.f32.mrf.mxu0 }
 0x4d0   : > { %v1986_v17 = vpop.f32.mrf.mxu2  ;;  %v2016_v36 = vpop.f32.mrf.mxu0 }
 0x4d1   : > { %v1987_v18 = vadd.f32 %v6156_v10, %v1986_v17  ;;  %v5782_v17 = vld [vmem:[#allocation19 + $0x28] sm:$0xff] }
 0x4d2   : > { %v2028_v25 = vpop.f32.mrf.mxu1  ;;  %2709 = vmatpush.bf16.msrb.mxu3 %v5782_v17 }
 0x4d3   : > { %v2001_v21 = vadd.f32 %v2000_v16, %v1987_v18  ;;  %v5799_v16 = vld [vmem:[#allocation19 + $0xb0] sm:$0xff] }
 0x4d4   : > { %2736 = vmatpush.bf16.msra.mxu1 %v5799_v16  ;;  %v5791_v18 = vld [vmem:[#allocation19 + $0x70] sm:$0xff] }
 0x4d5   : > { %v2015_v26 = vadd.f32 %v2014_v19, %v2001_v21  ;;  %v5798_v19 = vld [vmem:[#allocation19 + $0xa8] sm:$0xff]  ;;  %2722 = vmatpush.bf16.msrb.mxu0 %v5791_v18 }
 0x4d6   : > { %2710 = vmatpush.bf16.msrb.mxu3 %v5781_v20  ;;  %v5790_v21 = vld [vmem:[#allocation19 + $0x68] sm:$0xff] }
 0x4d7   : > { %v2029_v29 = vadd.f32 %v2028_v25, %v2015_v26  ;;  %v5789_v25 = vld [vmem:[#allocation19 + $0x60] sm:$0xff]  ;;  %v5796_v26 = vld [vmem:[#allocation19 + $0x98] sm:$0xff] }
 0x4d8   : > { %v1988_v28 = vpop.f32.mrf.mxu2  ;;  %2737 = vmatpush.bf16.msra.mxu1 %v5798_v19 }
 0x4d9   : > { %v1989_v30 = vadd.f32 %v6156_v10, %v1988_v28  ;;  %v2033_v37 = vmax.f32 %v2029_v29, 0.0  ;;  %2723 = vmatpush.bf16.msrb.mxu0 %v5790_v21  ;;  %v5779_v28 = vld [vmem:[#allocation19 + $0x10] sm:$0xff]  ;;  %v5788_v29 = vld [vmem:[#allocation19 + $0x58] sm:$0xff] }
 0x4da   : > { %v2030_v39 = vpop.f32.mrf.mxu1  ;;  %2711 = vmatpush.bf16.msrb.mxu3 %v5780_v22 }
 0x4db   : > { %v2003_v34 = vadd.f32 %v2002_v33, %v1989_v30  ;;  %v2035_v41 = vpack.c.bf16 %v2033_v37, %v2033_v37  ;;  %v5795_v30 = vld [vmem:[#allocation19 + $0x90] sm:$0xff] }
 0x4dd   : > { %v2017_v6 = vadd.f32 %v2016_v36, %v2003_v34  ;;  %v2039_v44 = vunpack.c.l.b16 %v2035_v41  ;;  %2724 = vmatpush.bf16.msrb.mxu0 %v5789_v25  ;;  %v5777_v41 = vld [vmem:[#allocation19] sm:$0xff] }
 0x4de   : > { %2712 = vmatpush.bf16.msrb.mxu3 %v5779_v28  ;;  %v5835_v28 = vld [vmem:[#allocation22 + $0xf0] sm:$0xff] }
 0x4df   : > { %v2031_v40 = vadd.f32 %v2030_v39, %v2017_v6  ;;  %v5787_v6 = vld [vmem:[#allocation19 + $0x50] sm:$0xff]  ;;  %v5794_v39 = vld [vmem:[#allocation19 + $0x88] sm:$0xff] }
 0x4e1   : > { %v2034_v42 = vmax.f32 %v2031_v40, 0.0  ;;  %2725 = vmatpush.bf16.msrb.mxu0 %v5788_v29  ;;  %v5809_v29 = vld [vmem:[#allocation22 + $0x20] sm:$0xff] }
 0x4e2   : > { %2713 = vmatpush.bf16.msrb.mxu3 %v5778_v35  ;;  %v5808_v35 = vld [vmem:[#allocation22 + $0x18] sm:$0xff] }
 0x4e3   : > { %v2036_v43 = vpack.c.bf16 %v2034_v42, %v2034_v42 }
 0x4e5   : > { %v2040_v45 = vunpack.c.l.b16 %v2036_v43  ;;  %2726 = vmatpush.bf16.msrb.mxu0 %v5787_v6  ;;  %v5786_v43 = vld [vmem:[#allocation19 + $0x48] sm:$0xff] }
 0x4e6   : > { %2714 = vmatpush.bf16.msrb.mxu3 %v5777_v41  ;;  %v5833_v6 = vld [vmem:[#allocation22 + $0xe0] sm:$0xff]  ;;  %v5823_v41 = vld [vmem:[#allocation22 + $0x90] sm:$0xff] }
 0x4e7   : > { %v2041_v46 = vpack.c.b16 %v2040_v45, %v2039_v44  ;;  %v5793_v44 = vld [vmem:[#allocation19 + $0x80] sm:$0xff] }
 0x4e9   : > { %v2042_v49 = vrot.slane %v2041_v46, 7  ;;  %2727 = vmatpush.bf16.msrb.mxu0 %v5786_v43  ;;  %v5806_v43 = vld [vmem:[#allocation22 + $0x8] sm:$0xff] }
 0x4eb   : > { %v2044_v31 = vsel %vm1172_vm9, 0, %v2042_v49  ;;  %v2046_v32 = vsel %vm1172_vm9, %v2042_v49, 0  ;;  %5008 = vmatmul.msk.bf16.vlgmr.msra.gmra.mxu2 %vm7218_vm13, %v2042_v49 }
 0x4ec   : > { %v2060_v50 = vrot.slane %v2044_v31, 1  ;;  %v2061_v51 = vrot.slane %v2046_v32, 1  ;;  %v2047_v52 = vshrl.u32 %v2044_v31, 16  ;;  %v2049_v53 = vshll.u32 %v2044_v31, 16  ;;  %2793 = vmatpush.bf16.msra.mxu2 %v5804_v48 }
 0x4ed   : > { %v2053_v55 = vshll.u32 %v2046_v32, 16  ;;  %v2067_v56 = vshrl.u32 %v2046_v32, 16  ;;  %v2074_v8 = vrot.slane %v2044_v31, 2  ;;  %v2075_v9 = vrot.slane %v2046_v32, 2  ;;  %v5785_v31 = vld [vmem:[#allocation19 + $0x40] sm:$0xff] }
 0x4ee   : > { %v2062_v57 = vsel %vm1054_vm3, %v2060_v50, %v2061_v51  ;;  %v2051_v58 = vrot.slane %v2049_v53, 1  ;;  %v2064_v59 = vrot.slane %v2047_v52, 1  ;;  %v2065_v60 = vrot.slane %v2049_v53, 2  ;;  %v5812_v51 = vld [vmem:[#allocation22 + $0x38] sm:$0xff]  ;;  %2728 = vmatpush.bf16.msrb.mxu0 %v5785_v31  ;;  %v5814_v31 = vld [vmem:[#allocation22 + $0x48] sm:$0xff] }
 0x4ef   : > { %2438 = vmatmul.bf16.vlgmr.msra.gmra.mxu0 %v2062_v57  ;;  %v2069_v61 = vrot.slane %v2067_v56, 1  ;;  %v2070_v62 = vrot.slane %v2053_v55, 2  ;;  %v2055_v0 = vrot.slane %v2053_v55, 1  ;;  %v2076_v10 = vsel %vm1072_vm7, %v2074_v8, %v2075_v9  ;;  %v5836_v55 = vld [vmem:[#allocation22 + $0xf8] sm:$0xff] }
 0x4f0   : > { %v2052_v63 = vor.u32 %v2051_v58, %v2047_v52  ;;  %v2066_v1 = vor.u32 %v2065_v60, %v2064_v59  ;;  %2794 = vmatpush.bf16.msra.mxu2 %v5803_v54  ;;  %v5828_v52 = vld [vmem:[#allocation22 + $0xb8] sm:$0xff]  ;;  %v5811_v58 = vld [vmem:[#allocation22 + $0x30] sm:$0xff] }
 0x4f1   : > { %v2071_v3 = vor.u32 %v2070_v62, %v2069_v61  ;;  %v5820_v54 = vld [vmem:[#allocation22 + $0x78] sm:$0xff]  ;;  %v5827_v59 = vld [vmem:[#allocation22 + $0xb0] sm:$0xff] }
 0x4f2   : > { %v2056_v4 = vsel %vm1037_vm5, %v2052_v63, %v2055_v0  ;;  %3406 = vmatpush.bf16.msra.mxu0 %v5820_v54  ;;  %v5810_v63 = vld [vmem:[#allocation22 + $0x28] sm:$0xff]  ;;  %v5829_v54 = vld [vmem:[#allocation22 + $0xc0] sm:$0xff] }
 0x4f3   : > { %2424 = vmatmul.bf16.vlgmr.msra.gmra.mxu3 %v2056_v4  ;;  %v2072_v5 = vsel %vm1060_vm4, %v2066_v1, %v2071_v3 }
 0x4f4   : > { %2452 = vmatmul.bf16.vlgmr.msrb.gmra.mxu1 %v2072_v5  ;;  %2795 = vmatpush.bf16.msra.mxu2 %v5802_v2 }
 0x4f5   : > { %3392 = vmatpush.bf16.msra.mxu3 %v5812_v51  ;;  %v5860_v51 = vld [vmem:[#allocation22 + $0x1b8] sm:$0xff] }
 0x4f8   : > { %2796 = vmatpush.bf16.msra.mxu2 %v5801_v7 }
 0x4f9   : > { %3393 = vmatpush.bf16.msra.mxu3 %v5811_v58  ;;  %v5842_v58 = vld [vmem:[#allocation22 + $0x128] sm:$0xff] }
 0x4fb   : > { %2466 = vmatmul.bf16.vlgmr.msrb.gmra.mxu2 %v2076_v10 }
 0x4fc   : > { %3434 = vmatpush.bf16.msrb.mxu2 %v5836_v55  ;;  %v5852_v55 = vld [vmem:[#allocation22 + $0x178] sm:$0xff] }
 0x4fd   : > { %3394 = vmatpush.bf16.msra.mxu3 %v5810_v63 }
 0x500   : > { %3435 = vmatpush.bf16.msrb.mxu2 %v5835_v28 }
 0x501   : > { %3395 = vmatpush.bf16.msra.mxu3 %v5809_v29  ;;  %v5838_v29 = vld [vmem:[#allocation22 + $0x108] sm:$0xff] }
 0x505   : > { %3396 = vmatpush.bf16.msra.mxu3 %v5808_v35 }
 0x50b   : > { %5121 = vmatmul.msk.bf16.vlgmr.msra.gmra.mxu2 %vm1208_vm11, %v7179_v23  ;;  %v5797_v23 = vld [vmem:[#allocation19 + $0xa0] sm:$0xff] }
 0x50c   : > { %2738 = vmatpush.bf16.msra.mxu1 %v5797_v23 }
 0x510   : > { %2739 = vmatpush.bf16.msra.mxu1 %v5796_v26  ;;  %v5819_v26 = vld [vmem:[#allocation22 + $0x70] sm:$0xff] }
 0x511   : > { %3407 = vmatpush.bf16.msra.mxu0 %v5819_v26  ;;  %v5864_v26 = vld [vmem:[#allocation22 + $0x1d8] sm:$0xff] }
 0x514   : > { %2740 = vmatpush.bf16.msra.mxu1 %v5795_v30  ;;  %v5818_v30 = vld [vmem:[#allocation22 + $0x68] sm:$0xff] }
 0x515   : > { %3408 = vmatpush.bf16.msra.mxu0 %v5818_v30 }
 0x518   : > { %2741 = vmatpush.bf16.msra.mxu1 %v5794_v39  ;;  %v5807_v39 = vld [vmem:[#allocation22 + $0x10] sm:$0xff] }
 0x519   : > { %3397 = vmatpush.bf16.msra.mxu3 %v5807_v39  ;;  %v5837_v39 = vld [vmem:[#allocation22 + $0x100] sm:$0xff] }
 0x51c   : > { %2742 = vmatpush.bf16.msra.mxu1 %v5793_v44  ;;  %v5815_v44 = vld [vmem:[#allocation22 + $0x50] sm:$0xff] }
 0x51d   : > { %3398 = vmatpush.bf16.msra.mxu3 %v5806_v43 }
 0x520   : > { %3420 = vmatpush.bf16.msrb.mxu1 %v5828_v52  ;;  %v5843_v52 = vld [vmem:[#allocation22 + $0x130] sm:$0xff] }
 0x524   : > { %3421 = vmatpush.bf16.msrb.mxu1 %v5827_v59  ;;  %v6159_v59 = vld [vmem:[#allocation20] ss:$0 sm:$0xff] }
 0x56c   : > { %v2439_v33 = vpop.f32.mrf.mxu0 }
 0x56e   : > { %v2411_v24 = vpop.f32.mrf.mxu2 }
 0x56f   : > { %v2412_v34 = vadd.f32 %v6157_v27, %v2411_v24 }
 0x571   : > { %v2453_v42 = vpop.f32.mrf.mxu1 }
 0x574   : > { %v2441_v53 = vpop.f32.mrf.mxu0 }
 0x576   : > { %v2413_v36 = vpop.f32.mrf.mxu2  ;;  %v2425_v37 = vpop.f32.mrf.mxu3 }
 0x577   : > { %v2426_v40 = vadd.f32 %v2425_v37, %v2412_v34  ;;  %v2414_v46 = vadd.f32 %v6157_v27, %v2413_v36  ;;  %v5826_v27 = vld [vmem:[#allocation22 + $0xa8] sm:$0xff]  ;;  %v5817_v36 = vld [vmem:[#allocation22 + $0x60] sm:$0xff]  ;;  %v5824_v37 = vld [vmem:[#allocation22 + $0x98] sm:$0xff] }
 0x578   : > { %3422 = vmatpush.bf16.msrb.mxu1 %v5826_v27  ;;  %v5834_v34 = vld [vmem:[#allocation22 + $0xe8] sm:$0xff]  ;;  %3409 = vmatpush.bf16.msra.mxu0 %v5817_v36 }
 0x579   : > { %v2440_v45 = vadd.f32 %v2439_v33, %v2426_v40  ;;  %v2455_v60 = vpop.f32.mrf.mxu1  ;;  %v5825_v33 = vld [vmem:[#allocation22 + $0xa0] sm:$0xff]  ;;  %3436 = vmatpush.bf16.msrb.mxu2 %v5834_v34  ;;  %v5816_v40 = vld [vmem:[#allocation22 + $0x58] sm:$0xff]  ;;  %v5847_v34 = vld [vmem:[#allocation22 + $0x150] sm:$0xff] }
 0x57b   : > { %v2454_v50 = vadd.f32 %v2453_v42, %v2440_v45  ;;  %v5832_v42 = vld [vmem:[#allocation22 + $0xd8] sm:$0xff]  ;;  %v5822_v45 = vld [vmem:[#allocation22 + $0x88] sm:$0xff] }
 0x57c   : > { %3423 = vmatpush.bf16.msrb.mxu1 %v5825_v33  ;;  %3410 = vmatpush.bf16.msra.mxu0 %v5816_v40 }
 0x57d   : > { %3437 = vmatpush.bf16.msrb.mxu2 %v5833_v6  ;;  %v5863_v6 = vld [vmem:[#allocation22 + $0x1d0] sm:$0xff] }
 0x57e   : > { %v2427_v48 = vpop.f32.mrf.mxu3  ;;  %v2467_v49 = vpop.f32.mrf.mxu2 }
 0x57f   : > { %v2428_v32 = vadd.f32 %v2427_v48, %v2414_v46  ;;  %v2468_v57 = vadd.f32 %v2467_v49, %v2454_v50  ;;  %v5831_v46 = vld [vmem:[#allocation22 + $0xd0] sm:$0xff]  ;;  %v5805_v48 = vld [vmem:[#allocation22] sm:$0xff]  ;;  %v5844_v49 = vld [vmem:[#allocation22 + $0x138] sm:$0xff] }
 0x580   : > { %3424 = vmatpush.bf16.msrb.mxu1 %v5824_v37  ;;  %3411 = vmatpush.bf16.msra.mxu0 %v5815_v44  ;;  %v5830_v50 = vld [vmem:[#allocation22 + $0xc8] sm:$0xff]  ;;  %v5853_v44 = vld [vmem:[#allocation22 + $0x180] sm:$0xff] }
 0x581   : > { %v2442_v56 = vadd.f32 %v2441_v53, %v2428_v32  ;;  %v2472_v61 = vmax.f32 %v2468_v57, 0.0  ;;  %3438 = vmatpush.bf16.msrb.mxu2 %v5832_v42  ;;  %3399 = vmatpush.bf16.msra.mxu3 %v5805_v48  ;;  %v5821_v32 = vld [vmem:[#allocation22 + $0x80] sm:$0xff]  ;;  %v5868_v57 = vld [vmem:[#allocation22 + $0x1f8] sm:$0xff]  ;;  %v5854_v37 = vld [vmem:[#allocation22 + $0x188] sm:$0xff] }
 0x582   : > { %v5813_v53 = vld [vmem:[#allocation22 + $0x40] sm:$0xff]  ;;  %v5846_v42 = vld [vmem:[#allocation22 + $0x148] sm:$0xff] }
 0x583   : > { %v2456_v62 = vadd.f32 %v2455_v60, %v2442_v56  ;;  %v2474_v2 = vpack.c.bf16 %v2472_v61, %v2472_v61  ;;  %v5859_v56 = vld [vmem:[#allocation22 + $0x1b0] sm:$0xff]  ;;  %v5858_v61 = vld [vmem:[#allocation22 + $0x1a8] sm:$0xff] }
 0x584   : > { %3425 = vmatpush.bf16.msrb.mxu1 %v5823_v41  ;;  %3412 = vmatpush.bf16.msra.mxu0 %v5814_v31  ;;  %v5851_v60 = vld [vmem:[#allocation22 + $0x170] sm:$0xff] }
 0x585   : > { %v2478_v5 = vunpack.c.l.b16 %v2474_v2  ;;  %3439 = vmatpush.bf16.msrb.mxu2 %v5831_v46 }
 0x586   : > { %v2469_v0 = vpop.f32.mrf.mxu2 }
 0x587   : > { %v2470_v1 = vadd.f32 %v2469_v0, %v2456_v62  ;;  %v5867_v62 = vld [vmem:[#allocation22 + $0x1f0] sm:$0xff]  ;;  %v5841_v0 = vld [vmem:[#allocation22 + $0x120] sm:$0xff] }
 0x588   : > { %3426 = vmatpush.bf16.msrb.mxu1 %v5822_v45  ;;  %3413 = vmatpush.bf16.msra.mxu0 %v5813_v53  ;;  %v5862_v45 = vld [vmem:[#allocation22 + $0x1c8] sm:$0xff] }
 0x589   : > { %v2473_v3 = vmax.f32 %v2470_v1, 0.0  ;;  %3440 = vmatpush.bf16.msrb.mxu2 %v5830_v50 }
 0x58b   : > { %v2475_v4 = vpack.c.bf16 %v2473_v3, %v2473_v3 }
 0x58c   : > { %3427 = vmatpush.bf16.msrb.mxu1 %v5821_v32  ;;  %v5861_v32 = vld [vmem:[#allocation22 + $0x1c0] sm:$0xff] }
 0x58d   : > { %v2479_v7 = vunpack.c.l.b16 %v2475_v4  ;;  %3441 = vmatpush.bf16.msrb.mxu2 %v5829_v54 }
 0x58e   : > { %v2798_v3 = vpop.f32.mrf.mxu2 }
 0x58f   : > { %v2480_v8 = vpack.c.b16 %v2479_v7, %v2478_v5  ;;  %v5850_v5 = vld [vmem:[#allocation22 + $0x168] sm:$0xff] }
 0x591   : > { %v2482_v9 = vshrl.u32 %v2480_v8, 16  ;;  %v2485_v12 = vshll.u32 %v2480_v8, 16  ;;  %3490 = vmatpush.bf16.msra.mxu2 %v5868_v57  ;;  %v5857_v8 = vld [vmem:[#allocation22 + $0x1a0] sm:$0xff] }
 0x593   : > { %v2484_v10 = vrot.slane %v2482_v9, 7  ;;  %v5866_v9 = vld [vmem:[#allocation22 + $0x1e8] sm:$0xff] }
 0x595   : > { %v2491_v13 = vsel %vm7166_vm12, %v2484_v10, 0  ;;  %v2487_v14 = vor.u32 %v2485_v12, %v2484_v10  ;;  %3491 = vmatpush.bf16.msra.mxu2 %v5867_v62  ;;  %v5840_v10 = vld [vmem:[#allocation22 + $0x118] sm:$0xff] }
 0x596   : > { %v2508_v18 = vrot.slane %v2491_v13, 1  ;;  %v2500_v19 = vshll.u32 %v2491_v13, 16  ;;  %v5849_v13 = vld [vmem:[#allocation22 + $0x160] sm:$0xff]  ;;  %v2800_v27 = vpop.f32.mrf.mxu2 }
 0x597   : > { %v2490_v15 = vsel %vm7166_vm12, 0, %v2487_v14  ;;  %v6158_v14 = vld [vmem:[%s7338_s16] ss:$0 sm:$0xff] }
 0x598   : > { %v2495_v16 = vshll.u32 %v2490_v15, 16  ;;  %v2507_v17 = vrot.slane %v2490_v15, 1  ;;  %2715 = vmatmul.bf16.vlgmr.msrb.gmra.mxu3 %v2490_v15  ;;  %v2493_v20 = vshrl.u32 %v2490_v15, 16  ;;  %v2502_v24 = vrot.slane %v2500_v19, 1  ;;  %v5856_v15 = vld [vmem:[#allocation22 + $0x198] sm:$0xff] }
 0x599   : > { %3448 = vmatpush.bf16.msrb.mxu3 %v5844_v49  ;;  %3492 = vmatpush.bf16.msra.mxu2 %v5866_v9  ;;  %v2801_v35 = vadd.f32 %v6158_v14, %v2800_v27  ;;  %v5845_v49 = vld [vmem:[#allocation22 + $0x140] sm:$0xff] }
 0x59a   : > { %v2497_v21 = vrot.slane %v2495_v16, 1  ;;  %v2509_v23 = vsel %vm1054_vm3, %v2507_v17, %v2508_v18  ;;  %v5865_v16 = vld [vmem:[#allocation22 + $0x1e0] sm:$0xff]  ;;  %v5839_v18 = vld [vmem:[#allocation22 + $0x110] sm:$0xff] }
 0x59b   : > { %2743 = vmatmul.bf16.vlgmr.msra.gmra.mxu1 %v2509_v23  ;;  %v5848_v23 = vld [vmem:[#allocation22 + $0x158] sm:$0xff] }
 0x59c   : > { %v2498_v22 = vor.u32 %v2497_v21, %v2493_v20  ;;  %3476 = vmatpush.bf16.msra.mxu1 %v5860_v51 }
 0x59d   : > { %3449 = vmatpush.bf16.msrb.mxu3 %v5843_v52  ;;  %3493 = vmatpush.bf16.msra.mxu2 %v5865_v16 }
 0x59e   : > { %v2503_v25 = vsel %vm1037_vm5, %v2498_v22, %v2502_v24  ;;  %v2799_v22 = vadd.f32 %v6158_v14, %v2798_v3 }
 0x59f   : > { %2729 = vmatmul.bf16.vlgmr.msrb.gmra.mxu0 %v2503_v25  ;;  %v5855_v25 = vld [vmem:[#allocation22 + $0x190] sm:$0xff] }
 0x5a0   : > { %3462 = vmatpush.bf16.msrb.mxu0 %v5852_v55  ;;  %3477 = vmatpush.bf16.msra.mxu1 %v5859_v56 }
 0x5a1   : > { %3450 = vmatpush.bf16.msrb.mxu3 %v5842_v58  ;;  %3494 = vmatpush.bf16.msra.mxu2 %v5864_v26 }
 0x5a4   : > { %3463 = vmatpush.bf16.msrb.mxu0 %v5851_v60  ;;  %3478 = vmatpush.bf16.msra.mxu1 %v5858_v61 }
 0x5a5   : > { %3451 = vmatpush.bf16.msrb.mxu3 %v5841_v0  ;;  %3495 = vmatpush.bf16.msra.mxu2 %v5863_v6  ;;  %v5872_v6 = vld [vmem:[#allocation23 + $0x18] sm:$0xff] }
 0x5a8   : > { %3464 = vmatpush.bf16.msrb.mxu0 %v5850_v5  ;;  %3479 = vmatpush.bf16.msra.mxu1 %v5857_v8 }
 0x5a9   : > { %3452 = vmatpush.bf16.msrb.mxu3 %v5840_v10  ;;  %3496 = vmatpush.bf16.msra.mxu2 %v5862_v45 }
 0x5ac   : > { %3465 = vmatpush.bf16.msrb.mxu0 %v5849_v13  ;;  %3480 = vmatpush.bf16.msra.mxu1 %v5856_v15 }
 0x5ad   : > { %3453 = vmatpush.bf16.msrb.mxu3 %v5839_v18  ;;  %3497 = vmatpush.bf16.msra.mxu2 %v5861_v32  ;;  %v5869_v32 = vld [vmem:[#allocation23] sm:$0xff] }
 0x5b0   : > { %3466 = vmatpush.bf16.msrb.mxu0 %v5848_v23  ;;  %3481 = vmatpush.bf16.msra.mxu1 %v5855_v25 }
 0x5b1   : > { %3454 = vmatpush.bf16.msrb.mxu3 %v5838_v29 }
 0x5b4   : > { %3467 = vmatpush.bf16.msrb.mxu0 %v5847_v34  ;;  %3482 = vmatpush.bf16.msra.mxu1 %v5854_v37  ;;  %v5876_v34 = vld [vmem:[#allocation23 + $0x38] sm:$0xff]  ;;  %v5873_v37 = vld [vmem:[#allocation23 + $0x20] sm:$0xff] }
 0x5b5   : > { %3455 = vmatpush.bf16.msrb.mxu3 %v5837_v39  ;;  %v5892_v39 = vld [vmem:[#allocation23 + $0xb8] sm:$0xff] }
 0x5b8   : > { %3468 = vmatpush.bf16.msrb.mxu0 %v5846_v42  ;;  %3483 = vmatpush.bf16.msra.mxu1 %v5853_v44  ;;  %v5891_v42 = vld [vmem:[#allocation23 + $0xb0] sm:$0xff]  ;;  %v5870_v44 = vld [vmem:[#allocation23 + $0x8] sm:$0xff] }
 0x5bc   : > { %3469 = vmatpush.bf16.msrb.mxu0 %v5845_v49  ;;  %v5899_v49 = vld [vmem:[#allocation23 + $0xf0] sm:$0xff] }
 0x618   : > { %v2744_v4 = vpop.f32.mrf.mxu1 }
 0x61b   : > { %v2716_v63 = vpop.f32.mrf.mxu3 }
 0x61c   : > { %v2717_v1 = vadd.f32 %v6159_v59, %v2716_v63  ;;  %v2730_v2 = vpop.f32.mrf.mxu0 }
 0x61e   : > { %v2731_v7 = vadd.f32 %v2730_v2, %v2717_v1 }
 0x620   : > { %v2745_v12 = vadd.f32 %v2744_v4, %v2731_v7  ;;  %v2746_v28 = vpop.f32.mrf.mxu1 }
 0x622   : > { %v2749_v19 = vmax.f32 %v2745_v12, 0.0 }
 0x623   : > { %v2718_v17 = vpop.f32.mrf.mxu3 }
 0x624   : > { %v2719_v20 = vadd.f32 %v6159_v59, %v2718_v17  ;;  %v2732_v21 = vpop.f32.mrf.mxu0  ;;  %v2803_v30 = vadd.f32 %v2799_v22, %v2749_v19 }
 0x626   : > { %v2733_v24 = vadd.f32 %v2732_v21, %v2719_v20  ;;  %v2805_v40 = vpack.c.bf16 %v2803_v30, %v2803_v30 }
 0x628   : > { %v2747_v33 = vadd.f32 %v2746_v28, %v2733_v24  ;;  %v2809_v46 = vunpack.c.l.b16 %v2805_v40  ;;  %v5871_v40 = vld [vmem:[#allocation23 + $0x10] sm:$0xff] }
 0x62a   : > { %v2750_v36 = vmax.f32 %v2747_v33, 0.0 }
 0x62c   : > { %v2804_v41 = vadd.f32 %v2801_v35, %v2750_v36  ;;  %v5875_v35 = vld [vmem:[#allocation23 + $0x30] sm:$0xff]  ;;  %v5874_v36 = vld [vmem:[#allocation23 + $0x28] sm:$0xff] }
 0x62e   : > { %v2806_v43 = vpack.c.bf16 %v2804_v41, %v2804_v41  ;;  %v5884_v41 = vld [vmem:[#allocation23 + $0x78] sm:$0xff] }
 0x630   : > { %v2810_v48 = vunpack.c.l.b16 %v2806_v43  ;;  %v5900_v43 = vld [vmem:[#allocation23 + $0xf8] sm:$0xff] }
 0x632   : > { %v2811_v31 = vpack.c.b16 %v2810_v48, %v2809_v46  ;;  %v5883_v46 = vld [vmem:[#allocation23 + $0x70] sm:$0xff]  ;;  %v5890_v48 = vld [vmem:[#allocation23 + $0xa8] sm:$0xff] }
 0x634   : > { %v2813_v50 = vshrl.u32 %v2811_v31, 16  ;;  %v2816_v51 = vshll.u32 %v2811_v31, 16  ;;  %v6160_v31 = vld [vmem:[%s7340_s18] ss:$0 sm:$0xff] }
 0x636   : > { %v2815_v52 = vrot.slane %v2813_v50, 6  ;;  %v2818_v53 = vrot.slane %v2816_v51, 7  ;;  %v5882_v50 = vld [vmem:[#allocation23 + $0x68] sm:$0xff]  ;;  %v5889_v51 = vld [vmem:[#allocation23 + $0xa0] sm:$0xff] }
 0x638   : > { %v2819_v54 = vor.u32 %v2818_v53, %v2815_v52  ;;  %v5898_v53 = vld [vmem:[#allocation23 + $0xe8] sm:$0xff] }
 0x63a   : > { %v2821_v55 = vsel %vm7118_vm2, 0, %v2819_v54  ;;  %v2822_v56 = vsel %vm7118_vm2, %v2819_v54, 0  ;;  %vm7409_vm2 = vmmov %vm7406_vm10  ;;  %v5908_v54 = vld [vmem:[#allocation23 + $0x138] sm:$0xff] }
 0x63b   : > { %v2826_v57 = vshll.u32 %v2821_v55, 16  ;;  %3400 = vmatmul.bf16.vlgmr.msra.gmra.mxu3 %v2821_v55  ;;  %v2838_v58 = vrot.slane %v2821_v55, 1  ;;  %v2839_v59 = vrot.slane %v2822_v56, 1  ;;  %v2824_v60 = vshrl.u32 %v2821_v55, 16 }
 0x63c   : > { %v2831_v61 = vshll.u32 %v2822_v56, 16  ;;  %v2845_v62 = vshrl.u32 %v2822_v56, 16  ;;  %v2852_v12 = vrot.slane %v2821_v55, 2  ;;  %v2853_v13 = vrot.slane %v2822_v56, 2  ;;  %3873 = vmatpush.bf16.msra.mxu3 %v5876_v34 }
 0x63d   : > { %v2840_v63 = vsel %vm1054_vm3, %v2838_v58, %v2839_v59  ;;  %v2828_v0 = vrot.slane %v2826_v57, 1  ;;  %v2842_v1 = vrot.slane %v2824_v60, 1  ;;  %v2843_v2 = vrot.slane %v2826_v57, 2  ;;  %v5888_v58 = vld [vmem:[#allocation23 + $0x98] sm:$0xff]  ;;  %v5897_v59 = vld [vmem:[#allocation23 + $0xe0] sm:$0xff] }
 0x63e   : > { %3428 = vmatmul.bf16.vlgmr.msrb.gmra.mxu1 %v2840_v63  ;;  %v2847_v3 = vrot.slane %v2845_v62, 1  ;;  %v2848_v4 = vrot.slane %v2831_v61, 2  ;;  %v2833_v7 = vrot.slane %v2831_v61, 1  ;;  %v2854_v14 = vsel %vm1072_vm7, %v2852_v12, %v2853_v13  ;;  %v5905_v12 = vld [vmem:[#allocation23 + $0x120] sm:$0xff] }
 0x63f   : > { %v2829_v5 = vor.u32 %v2828_v0, %v2824_v60  ;;  %v2844_v8 = vor.u32 %v2843_v2, %v2842_v1  ;;  %v2864_v15 = vrot.slane %v2821_v55, 3  ;;  %v2865_v16 = vrot.slane %v2822_v56, 3  ;;  %3901 = vmatpush.bf16.msrb.mxu1 %v5892_v39  ;;  %v5880_v2 = vld [vmem:[#allocation23 + $0x58] sm:$0xff] }
 0x640   : > { %v2849_v11 = vor.u32 %v2848_v4, %v2847_v3  ;;  %v2856_v17 = vrot.slane %v2824_v60, 2  ;;  %v2857_v18 = vrot.slane %v2826_v57, 3  ;;  %v2859_v19 = vrot.slane %v2845_v62, 2  ;;  %3874 = vmatpush.bf16.msra.mxu3 %v5875_v35  ;;  %v5887_v3 = vld [vmem:[#allocation23 + $0x90] sm:$0xff]  ;;  %v5896_v4 = vld [vmem:[#allocation23 + $0xd8] sm:$0xff]  ;;  %v5902_v35 = vld [vmem:[#allocation23 + $0x108] sm:$0xff] }
 0x641   : > { %v2834_v9 = vsel %vm1037_vm5, %v2829_v5, %v2833_v7  ;;  %v2860_v20 = vrot.slane %v2831_v61, 3  ;;  %v2868_v21 = vrot.slane %v2824_v60, 3  ;;  %v2869_v23 = vrot.slane %v2826_v57, 4  ;;  %v5881_v57 = vld [vmem:[#allocation23 + $0x60] sm:$0xff]  ;;  %v5907_v60 = vld [vmem:[#allocation23 + $0x130] sm:$0xff]  ;;  %v5906_v5 = vld [vmem:[#allocation23 + $0x128] sm:$0xff] }
 0x642   : > { %3414 = vmatmul.bf16.vlgmr.msra.gmra.mxu0 %v2834_v9  ;;  %v2850_v10 = vsel %vm1060_vm4, %v2844_v8, %v2849_v11  ;;  %v2871_v22 = vrot.slane %v2845_v62, 3  ;;  %v2872_v24 = vrot.slane %v2831_v61, 4  ;;  %v2866_v25 = vsel %vm7409_vm2, %v2864_v15, %v2865_v16  ;;  %v5879_v11 = vld [vmem:[#allocation23 + $0x50] sm:$0xff]  ;;  %v5886_v9 = vld [vmem:[#allocation23 + $0x88] sm:$0xff]  ;;  %v5885_v16 = vld [vmem:[#allocation23 + $0x80] sm:$0xff] }
 0x643   : > { %3442 = vmatmul.bf16.vlgmr.msrb.gmra.mxu2 %v2850_v10  ;;  %v2858_v26 = vor.u32 %v2857_v18, %v2856_v17  ;;  %v2861_v27 = vor.u32 %v2860_v20, %v2859_v19  ;;  %v2870_v28 = vor.u32 %v2869_v23, %v2868_v21  ;;  %3887 = vmatpush.bf16.msra.mxu0 %v5884_v41  ;;  %v5895_v10 = vld [vmem:[#allocation23 + $0xd0] sm:$0xff]  ;;  %v5878_v15 = vld [vmem:[#allocation23 + $0x48] sm:$0xff]  ;;  %v5904_v20 = vld [vmem:[#allocation23 + $0x118] sm:$0xff] }
 0x644   : > { %v2873_v29 = vor.u32 %v2872_v24, %v2871_v22  ;;  %3875 = vmatpush.bf16.msra.mxu3 %v5874_v36  ;;  %3915 = vmatpush.bf16.msrb.mxu2 %v5900_v43  ;;  %v5894_v19 = vld [vmem:[#allocation23 + $0xc8] sm:$0xff]  ;;  %v5901_v41 = vld [vmem:[#allocation23 + $0x100] sm:$0xff] }
 0x645   : > { %v2862_v30 = vsel %vm1078_vm6, %v2858_v26, %v2861_v27  ;;  %3902 = vmatpush.bf16.msrb.mxu1 %v5891_v42  ;;  %v5877_v26 = vld [vmem:[#allocation23 + $0x40] sm:$0xff] }
 0x646   : > { %v2874_v33 = vsel %vm1094_vm8, %v2870_v28, %v2873_v29  ;;  %v5893_v27 = vld [vmem:[#allocation23 + $0xc0] sm:$0xff]  ;;  %v5903_v28 = vld [vmem:[#allocation23 + $0x110] sm:$0xff] }
 0x647   : > { %3888 = vmatpush.bf16.msra.mxu0 %v5883_v46 }
 0x648   : > { %3876 = vmatpush.bf16.msra.mxu3 %v5873_v37  ;;  %3916 = vmatpush.bf16.msrb.mxu2 %v5899_v49 }
 0x649   : > { %3903 = vmatpush.bf16.msrb.mxu1 %v5890_v48 }
 0x64b   : > { %3456 = vmatmul.bf16.vlgmr.msrb.gmra.mxu3 %v2854_v14  ;;  %3889 = vmatpush.bf16.msra.mxu0 %v5882_v50 }
 0x64c   : > { %3877 = vmatpush.bf16.msra.mxu3 %v5872_v6  ;;  %3917 = vmatpush.bf16.msrb.mxu2 %v5898_v53 }
 0x64d   : > { %3904 = vmatpush.bf16.msrb.mxu1 %v5889_v51 }
 0x64e   : > { %3484 = vmatmul.bf16.vlgmr.msra.gmra.mxu1 %v2866_v25 }
 0x64f   : > { %3890 = vmatpush.bf16.msra.mxu0 %v5881_v57 }
 0x650   : > { %3878 = vmatpush.bf16.msra.mxu3 %v5871_v40  ;;  %3918 = vmatpush.bf16.msrb.mxu2 %v5897_v59 }
 0x651   : > { %3905 = vmatpush.bf16.msrb.mxu1 %v5888_v58 }
 0x652   : > { %3470 = vmatmul.bf16.vlgmr.msrb.gmra.mxu0 %v2862_v30 }
 0x653   : > { %3498 = vmatmul.bf16.vlgmr.msra.gmra.mxu2 %v2874_v33  ;;  %3891 = vmatpush.bf16.msra.mxu0 %v5880_v2 }
 0x654   : > { %3879 = vmatpush.bf16.msra.mxu3 %v5870_v44  ;;  %3919 = vmatpush.bf16.msrb.mxu2 %v5896_v4 }
 0x655   : > { %3906 = vmatpush.bf16.msrb.mxu1 %v5887_v3 }
 0x657   : > { %3892 = vmatpush.bf16.msra.mxu0 %v5879_v11 }
 0x658   : > { %3880 = vmatpush.bf16.msra.mxu3 %v5869_v32  ;;  %3920 = vmatpush.bf16.msrb.mxu2 %v5895_v10  ;;  %v5916_v10 = vld [vmem:[#allocation25 + $0x38] sm:$0xff] }
 0x659   : > { %3907 = vmatpush.bf16.msrb.mxu1 %v5886_v9 }
 0x65b   : > { %3893 = vmatpush.bf16.msra.mxu0 %v5878_v15  ;;  %v5931_v15 = vld [vmem:[#allocation25 + $0xb0] sm:$0xff] }
 0x65c   : > { %3929 = vmatpush.bf16.msrb.mxu3 %v5908_v54  ;;  %3921 = vmatpush.bf16.msrb.mxu2 %v5894_v19  ;;  %v5913_v19 = vld [vmem:[#allocation25 + $0x20] sm:$0xff] }
 0x65d   : > { %3908 = vmatpush.bf16.msrb.mxu1 %v5885_v16  ;;  %v5914_v16 = vld [vmem:[#allocation25 + $0x28] sm:$0xff] }
 0x65f   : > { %3894 = vmatpush.bf16.msra.mxu0 %v5877_v26  ;;  %v5911_v26 = vld [vmem:[#allocation25 + $0x10] sm:$0xff] }
 0x660   : > { %3930 = vmatpush.bf16.msrb.mxu3 %v5907_v60  ;;  %3922 = vmatpush.bf16.msrb.mxu2 %v5893_v27  ;;  %v6161_v27 = vld [vmem:[%s7342_s20] ss:$0 sm:$0xff] }
 0x663   : > { %4178 = vmatpush.bf16.msrb.mxu0 %v5916_v10 }
 0x664   : > { %3931 = vmatpush.bf16.msrb.mxu3 %v5906_v5 }
 0x668   : > { %3932 = vmatpush.bf16.msrb.mxu3 %v5905_v12  ;;  %v5932_v12 = vld [vmem:[#allocation25 + $0xb8] sm:$0xff] }
 0x669   : > { %4206 = vmatpush.bf16.msra.mxu2 %v5932_v12 }
 0x66c   : > { %3933 = vmatpush.bf16.msrb.mxu3 %v5904_v20  ;;  %v5922_v20 = vld [vmem:[#allocation25 + $0x68] sm:$0xff] }
 0x66d   : > { %4207 = vmatpush.bf16.msra.mxu2 %v5931_v15 }
 0x670   : > { %3934 = vmatpush.bf16.msrb.mxu3 %v5903_v28 }
 0x674   : > { %3935 = vmatpush.bf16.msrb.mxu3 %v5902_v35  ;;  %v5919_v35 = vld [vmem:[#allocation25 + $0x50] sm:$0xff] }
 0x678   : > { %3936 = vmatpush.bf16.msrb.mxu3 %v5901_v41 }
 0x6bb   : > { %v3429_v45 = vpop.f32.mrf.mxu1 }
 0x6be   : > { %v3401_v52 = vpop.f32.mrf.mxu3 }
 0x6bf   : > { %v3415_v55 = vpop.f32.mrf.mxu0  ;;  %v3402_v56 = vadd.f32 %v6160_v31, %v3401_v52 }
 0x6c1   : > { %v3416_v61 = vadd.f32 %v3415_v55, %v3402_v56 }
 0x6c3   : > { %v3431_v62 = vpop.f32.mrf.mxu1  ;;  %v3430_v7 = vadd.f32 %v3429_v45, %v3416_v61 }
 0x6c6   : > { %v3443_v63 = vpop.f32.mrf.mxu2  ;;  %v3403_v0 = vpop.f32.mrf.mxu3 }
 0x6c7   : > { %v3417_v1 = vpop.f32.mrf.mxu0  ;;  %v3404_v8 = vadd.f32 %v6160_v31, %v3403_v0  ;;  %v3444_v13 = vadd.f32 %v3443_v63, %v3430_v7 }
 0x6c9   : > { %v3418_v14 = vadd.f32 %v3417_v1, %v3404_v8 }
 0x6cb   : > { %v3485_v22 = vpop.f32.mrf.mxu1  ;;  %v3432_v24 = vadd.f32 %v3431_v62, %v3418_v14  ;;  %v5924_v14 = vld [vmem:[#allocation25 + $0x78] sm:$0xff] }
 0x6cc   : > { %4192 = vmatpush.bf16.msra.mxu1 %v5924_v14 }
 0x6ce   : > { %v3445_v17 = vpop.f32.mrf.mxu2  ;;  %v3457_v18 = vpop.f32.mrf.mxu3 }
 0x6cf   : > { %v3458_v21 = vadd.f32 %v3457_v18, %v3444_v13  ;;  %v3471_v23 = vpop.f32.mrf.mxu0  ;;  %v3446_v29 = vadd.f32 %v3445_v17, %v3432_v24  ;;  %v5915_v13 = vld [vmem:[#allocation25 + $0x30] sm:$0xff]  ;;  %v5930_v18 = vld [vmem:[#allocation25 + $0xa8] sm:$0xff]  ;;  %v5921_v24 = vld [vmem:[#allocation25 + $0x60] sm:$0xff] }
 0x6d0   : > { %4179 = vmatpush.bf16.msrb.mxu0 %v5915_v13  ;;  %v5923_v17 = vld [vmem:[#allocation25 + $0x70] sm:$0xff]  ;;  %4208 = vmatpush.bf16.msra.mxu2 %v5930_v18  ;;  %v5937_v18 = vld [vmem:[#allocation26 + $0x20] sm:$0xff] }
 0x6d1   : > { %v3472_v25 = vadd.f32 %v3471_v23, %v3458_v21  ;;  %4193 = vmatpush.bf16.msra.mxu1 %v5923_v17  ;;  %v5929_v21 = vld [vmem:[#allocation25 + $0xa0] sm:$0xff]  ;;  %v5912_v23 = vld [vmem:[#allocation25 + $0x18] sm:$0xff]  ;;  %v5939_v17 = vld [vmem:[#allocation26 + $0x30] sm:$0xff] }
 0x6d3   : > { %v3486_v30 = vadd.f32 %v3485_v22, %v3472_v25  ;;  %v3487_v40 = vpop.f32.mrf.mxu1  ;;  %v5928_v25 = vld [vmem:[#allocation25 + $0x98] sm:$0xff] }
 0x6d4   : > { %4180 = vmatpush.bf16.msrb.mxu0 %v5914_v16  ;;  %4209 = vmatpush.bf16.msra.mxu2 %v5929_v21  ;;  %v5940_v16 = vld [vmem:[#allocation26 + $0x38] sm:$0xff] }
 0x6d5   : > { %4194 = vmatpush.bf16.msra.mxu1 %v5922_v20  ;;  %v5935_v20 = vld [vmem:[#allocation26 + $0x10] sm:$0xff] }
 0x6d6   : > { %v3499_v33 = vpop.f32.mrf.mxu2  ;;  %v3459_v34 = vpop.f32.mrf.mxu3 }
 0x6d7   : > { %v3460_v36 = vadd.f32 %v3459_v34, %v3446_v29  ;;  %v3473_v37 = vpop.f32.mrf.mxu0  ;;  %v3500_v6 = vadd.f32 %v3499_v33, %v3486_v30  ;;  %v5920_v29 = vld [vmem:[#allocation25 + $0x58] sm:$0xff]  ;;  %v5927_v30 = vld [vmem:[#allocation25 + $0x90] sm:$0xff]  ;;  %v5910_v33 = vld [vmem:[#allocation25 + $0x8] sm:$0xff] }
 0x6d8   : > { %4181 = vmatpush.bf16.msrb.mxu0 %v5913_v19  ;;  %4210 = vmatpush.bf16.msra.mxu2 %v5928_v25  ;;  %v5936_v19 = vld [vmem:[#allocation26 + $0x18] sm:$0xff] }
 0x6d9   : > { %v3474_v39 = vadd.f32 %v3473_v37, %v3460_v36  ;;  %v3504_v43 = vmax.f32 %v3500_v6, 0.0  ;;  %4195 = vmatpush.bf16.msra.mxu1 %v5921_v24  ;;  %v5926_v36 = vld [vmem:[#allocation25 + $0x88] sm:$0xff]  ;;  %v5909_v6 = vld [vmem:[#allocation25] sm:$0xff] }
 0x6da   : > { %v5933_v24 = vld [vmem:[#allocation26] sm:$0xff] }
 0x6db   : > { %v3488_v42 = vadd.f32 %v3487_v40, %v3474_v39  ;;  %v3506_v46 = vpack.c.bf16 %v3504_v43, %v3504_v43  ;;  %v5925_v43 = vld [vmem:[#allocation25 + $0x80] sm:$0xff] }
 0x6dc   : > { %4182 = vmatpush.bf16.msrb.mxu0 %v5912_v23  ;;  %4211 = vmatpush.bf16.msra.mxu2 %v5927_v30  ;;  %v5934_v23 = vld [vmem:[#allocation26 + $0x8] sm:$0xff] }
 0x6dd   : > { %v3510_v31 = vunpack.c.l.b16 %v3506_v46  ;;  %4196 = vmatpush.bf16.msra.mxu1 %v5920_v29 }
 0x6de   : > { %v3501_v44 = vpop.f32.mrf.mxu2 }
 0x6df   : > { %v3502_v45 = vadd.f32 %v3501_v44, %v3488_v42  ;;  %v5918_v42 = vld [vmem:[#allocation25 + $0x48] sm:$0xff] }
 0x6e0   : > { %4183 = vmatpush.bf16.msrb.mxu0 %v5911_v26  ;;  %4212 = vmatpush.bf16.msra.mxu2 %v5926_v36  ;;  %v6771_v26 = vmov 16.0  }
 0x6e1   : > { %v3505_v48 = vmax.f32 %v3502_v45, 0.0  ;;  %4197 = vmatpush.bf16.msra.mxu1 %v5919_v35  ;;  %6163 = vrcp.f32 %v6771_v26 }
 0x6e3   : > { %v3507_v49 = vpack.c.bf16 %v3505_v48, %v3505_v48  ;;  %v5917_v48 = vld [vmem:[#allocation25 + $0x40] sm:$0xff] }
 0x6e4   : > { %4184 = vmatpush.bf16.msrb.mxu0 %v5910_v33  ;;  %4213 = vmatpush.bf16.msra.mxu2 %v5925_v43 }
 0x6e5   : > { %v3511_v32 = vunpack.c.l.b16 %v3507_v49  ;;  %4198 = vmatpush.bf16.msra.mxu1 %v5918_v42 }
 0x6e7   : > { %v3512_v50 = vpack.c.b16 %v3511_v32, %v3510_v31  ;;  %v6164_v33 = vpop.eup %6163 }
 0x6e8   : > { %4185 = vmatpush.bf16.msrb.mxu0 %v5909_v6 }
 0x6e9   : > { %v3513_v51 = vrot.slane %v3512_v50, 7  ;;  %4199 = vmatpush.bf16.msra.mxu1 %v5917_v48 }
 0x6eb   : > { %v3515_v52 = vsel %vm1172_vm9, 0, %v3513_v51  ;;  %v3517_v53 = vsel %vm1172_vm9, %v3513_v51, 0  ;;  %5539 = vmatmul.msk.bf16.vlgmr.msra.gmra.mxu3 %vm7218_vm13, %v3513_v51 }
 0x6ec   : > { %v3531_v54 = vrot.slane %v3515_v52, 1  ;;  %v3532_v55 = vrot.slane %v3517_v53, 1  ;;  %v3518_v56 = vshrl.u32 %v3515_v52, 16  ;;  %v3520_v57 = vshll.u32 %v3515_v52, 16  ;;  %4303 = vmatpush.bf16.msra.mxu3 %v5940_v16 }
 0x6ed   : > { %v3524_v58 = vshll.u32 %v3517_v53, 16  ;;  %v3538_v59 = vshrl.u32 %v3517_v53, 16  ;;  %v3545_v8 = vrot.slane %v3515_v52, 2  ;;  %v3546_v11 = vrot.slane %v3517_v53, 2 }
 0x6ee   : > { %v3533_v60 = vsel %vm1054_vm3, %v3531_v54, %v3532_v55  ;;  %v3522_v61 = vrot.slane %v3520_v57, 1  ;;  %v3535_v62 = vrot.slane %v3518_v56, 1  ;;  %v3536_v63 = vrot.slane %v3520_v57, 2 }
 0x6ef   : > { %3909 = vmatmul.bf16.vlgmr.msrb.gmra.mxu1 %v3533_v60  ;;  %v3540_v0 = vrot.slane %v3538_v59, 1  ;;  %v3541_v1 = vrot.slane %v3524_v58, 2  ;;  %v3526_v3 = vrot.slane %v3524_v58, 1  ;;  %v3547_v9 = vsel %vm1072_vm7, %v3545_v8, %v3546_v11 }
 0x6f0   : > { %v3523_v2 = vor.u32 %v3522_v61, %v3518_v56  ;;  %v3537_v4 = vor.u32 %v3536_v63, %v3535_v62  ;;  %4304 = vmatpush.bf16.msra.mxu3 %v5939_v17 }
 0x6f1   : > { %v3542_v5 = vor.u32 %v3541_v1, %v3540_v0 }
 0x6f2   : > { %v3527_v47 = vsel %vm1037_vm5, %v3523_v2, %v3526_v3 }
 0x6f3   : > { %3895 = vmatmul.bf16.vlgmr.msra.gmra.mxu0 %v3527_v47  ;;  %v3543_v7 = vsel %vm1060_vm4, %v3537_v4, %v3542_v5  ;;  %vm4316_vm4 = vcmask 16384  }
 0x6f4   : > { %3923 = vmatmul.bf16.vlgmr.msrb.gmra.mxu2 %v3543_v7  ;;  %4305 = vmatpush.bf16.msra.mxu3 %v5938_v38 }
 0x6f8   : > { %4306 = vmatpush.bf16.msra.mxu3 %v5937_v18 }
 0x6fb   : > { %3937 = vmatmul.bf16.vlgmr.msrb.gmra.mxu3 %v3547_v9 }
 0x6fc   : > { %4307 = vmatpush.bf16.msra.mxu3 %v5936_v19 }
 0x700   : > { %4308 = vmatpush.bf16.msra.mxu3 %v5935_v20 }
 0x704   : > { %4309 = vmatpush.bf16.msra.mxu3 %v5934_v23 }
 0x708   : > { %4310 = vmatpush.bf16.msra.mxu3 %v5933_v24 }
 0x76c   : > { %v3910_v39 = vpop.f32.mrf.mxu1 }
 0x76e   : > { %v3882_v22 = vpop.f32.mrf.mxu3 }
 0x76f   : > { %v3883_v34 = vadd.f32 %v6161_v27, %v3882_v22  ;;  %v6162_v22 = vld [vmem:[%s7410_s9] ss:$0 sm:$0xff]  ;;  %s6665_s9 = scalar_lea.hbm %s7412_s4, 2 }
 0x770   : > { %v3896_v28 = vpop.f32.mrf.mxu0  ;;  %p6667_p4 = scmp.lt.s32.totalorder %s6665_s9, %s6661_s26 }
 0x771   : > { %v3897_v41 = vadd.f32 %v3896_v28, %v3883_v34 }
 0x772   : > { %p6668_p7 = por %p6667_p4, %p6666_p3 }
 0x773   : > { %v3911_v46 = vadd.f32 %v3910_v39, %v3897_v41  ;;  %v4230_v39 = vmul.f32 16.0, %v6164_v33 }
 0x774   : > { %v3912_v51 = vpop.f32.mrf.mxu1  ;;  %p6669_p8 = pnand %p6668_p7, %p6664_p2 }
 0x775   : > { %v4231_v43 = vsub.f32 1.0, %v4230_v39 }
 0x776   : > { %v3884_v37 = vpop.f32.mrf.mxu3 }
 0x777   : > { %v3924_v40 = vpop.f32.mrf.mxu2  ;;  %v3885_v44 = vadd.f32 %v6161_v27, %v3884_v37 }
 0x778   : > { %v3898_v45 = vpop.f32.mrf.mxu0  ;;  %v3925_v31 = vadd.f32 %v3924_v40, %v3911_v46  ;;  %v4232_v46 = vmul.f32 %v6164_v33, %v4231_v43 }
 0x779   : > { %v3899_v32 = vadd.f32 %v3898_v45, %v3885_v44 }
 0x77b   : > { %v3913_v53 = vadd.f32 %v3912_v51, %v3899_v32 }
 0x77e   : > { %v3938_v49 = vpop.f32.mrf.mxu3 }
 0x77f   : > { %v3939_v50 = vadd.f32 %v3938_v49, %v3925_v31  ;;  %v3926_v52 = vpop.f32.mrf.mxu2  ;;  %v4233_v31 = vadd.f32 %v6164_v33, %v4232_v46 }
 0x780   : > { %v3927_v54 = vadd.f32 %v3926_v52, %v3913_v53 }
 0x781   : > { %v3943_v55 = vmax.f32 %v3939_v50, 0.0 }
 0x783   : > { %v3945_v58 = vpack.c.bf16 %v3943_v55, %v3943_v55  ;;  %v4254_v55 = vld [vmem:[%s7413_s25] sm:$0x1] }
 0x785   : > { %v3949_v61 = vunpack.c.l.b16 %v3945_v58 }
 0x786   : > { %v3940_v56 = vpop.f32.mrf.mxu3 }
 0x787   : > { %v3941_v57 = vadd.f32 %v3940_v56, %v3927_v54 }
 0x789   : > { %v3944_v59 = vmax.f32 %v3941_v57, 0.0 }
 0x78b   : > { %v3946_v60 = vpack.c.bf16 %v3944_v59, %v3944_v59 }
 0x78d   : > { %v3950_v62 = vunpack.c.l.b16 %v3946_v60 }
 0x78f   : > { %v3951_v63 = vpack.c.b16 %v3950_v62, %v3949_v61 }
 0x791   : > { %v3953_v0 = vshrl.u32 %v3951_v63, 16  ;;  %v3956_v2 = vshll.u32 %v3951_v63, 16 }
 0x793   : > { %v3955_v1 = vrot.slane %v3953_v0, 7 }
 0x795   : > { %v3962_v3 = vsel %vm7166_vm12, %v3955_v1, 0  ;;  %v3958_v4 = vor.u32 %v3956_v2, %v3955_v1 }
 0x796   : > { %v3979_v8 = vrot.slane %v3962_v3, 1  ;;  %v3971_v11 = vshll.u32 %v3962_v3, 16 }
 0x797   : > { %v3961_v5 = vsel %vm7166_vm12, 0, %v3958_v4 }
 0x798   : > { %v3966_v47 = vshll.u32 %v3961_v5, 16  ;;  %v3978_v7 = vrot.slane %v3961_v5, 1  ;;  %4186 = vmatmul.bf16.vlgmr.msrb.gmra.mxu0 %v3961_v5  ;;  %v3964_v9 = vshrl.u32 %v3961_v5, 16  ;;  %v3973_v14 = vrot.slane %v3971_v11, 1 }
 0x79a   : > { %v3968_v10 = vrot.slane %v3966_v47, 1  ;;  %v3980_v12 = vsel %vm1054_vm3, %v3978_v7, %v3979_v8  ;;  %vm4234_vm3 = vweird.f32 %v6164_v33 }
 0x79b   : > { %4214 = vmatmul.bf16.vlgmr.msra.gmra.mxu2 %v3980_v12  ;;  %v4235_v51 = vsel %vm4234_vm3, %v6164_v33, %v4233_v31 }
 0x79c   : > { %v3969_v13 = vor.u32 %v3968_v10, %v3964_v9 }
 0x79e   : > { %v3974_v15 = vsel %vm1037_vm5, %v3969_v13, %v3973_v14 }
 0x79f   : > { %4200 = vmatmul.bf16.vlgmr.msra.gmra.mxu1 %v3974_v15 }
 0x815   : > { %v4187_v21 = vpop.f32.mrf.mxu0 }
 0x816   : > { %v4188_v28 = vadd.f32 %v6162_v22, %v4187_v21 }
 0x81c   : > { %v4201_v25 = vpop.f32.mrf.mxu1 }
 0x81d   : > { %v4189_v29 = vpop.f32.mrf.mxu0  ;;  %v4202_v30 = vadd.f32 %v4201_v25, %v4188_v28 }
 0x81e   : > { %v4215_v27 = vpop.f32.mrf.mxu2  ;;  %v4190_v34 = vadd.f32 %v6162_v22, %v4189_v29 }
 0x81f   : > { %v4216_v36 = vadd.f32 %v4215_v27, %v4202_v30 }
 0x821   : > { %v4220_v41 = vmax.f32 %v4216_v36, 0.0 }
 0x824   : > { %v4203_v35 = vpop.f32.mrf.mxu1 }
 0x825   : > { %v4204_v37 = vadd.f32 %v4203_v35, %v4190_v34 }
 0x826   : > { %v4217_v6 = vpop.f32.mrf.mxu2 }
 0x827   : > { %v4218_v40 = vadd.f32 %v4217_v6, %v4204_v37 }
 0x829   : > { %v4221_v42 = vmax.f32 %v4218_v40, 0.0 }
 0x82b   : > { %v4222_v44 = vadd.f32 %v4221_v42, %v4220_v41 }
 0x82d   : > { %v4223_v45 = vrot.slane %v4222_v44, 4 }
 0x82f   : > { %v4224_v48 = vadd.f32 %v4223_v45, %v4222_v44 }
 0x831   : > { %v4225_v49 = vrot.slane %v4224_v48, 2 }
 0x833   : > { %v4226_v32 = vadd.f32 %v4225_v49, %v4224_v48 }
 0x835   : > { %v4227_v50 = vrot.slane %v4226_v32, 1 }
 0x837   : > { %v4228_v52 = vadd.f32 %v4227_v50, %v4226_v32 }
 0x839   : > { %v4236_v53 = vmul.f32 %v4235_v51, %v4228_v52 }
 0x83b   : > { %v4237_v54 = vpack.c.bf16 %v4236_v53, %v4236_v53 }
 0x83d   : > { %4311 = vmatmul.bf16.vlgmr.msra.gmra.mxu3 %v4237_v54 }
 0x8c0   : > { %v4312_v56 = vpop.f32.mrf.mxu3 }
 0x8c1   : > { %v4313_v57 = vadd.f32 %v4312_v56, %v4254_v55 }
 0x8c3   : > { %4317 = vst.msk [vmem:[%s1007_s12] sm:$0x1] %vm4316_vm4, %v4313_v57 }
 0x8c4   : > { %6672 = shalt.err (!%p6669_p8)
}
 0x8c5   : > { %6005 = dma.vmem_to_hbm [thread:$0]  (%p6940_p5), %s4330_s29, 16, %s4332_s22, %s4319_s30  }
 0x8c8   : > { %v4314_v58 = vpop.f32.mrf.mxu3 }
 0x8c9 PF: > { %s7415_s3 = sld [smem:[#allocation42_spill]] }
 0x8ca   : > { %s7416_s10 = sld [smem:[#allocation39_spill]] }
 0x8cf   : > { %p6092_p9 = scmp.ge.s32.totalorder %s7415_s3, 2 }
 0x8d0   : > { %s4343_s2 = sand.u32 1, %s7416_s10  }
 0x8d1   : > { %p6057_p10 = pnand %p6092_p9, %p6944_p6  ;;  %s4344_s28 = scalar_lea.sflag [#allocation4], %s4343_s2 }
 0x8d3   : > { %p6058_p11 = pneg %p6057_p10 }
 0x8d5   : > { %6726 = dma.done.wait (%p6058_p11), %s4344_s28, 16  }
 0x8d6   : > { %6728 = vsyncadd (%p6058_p11), %s4344_s28, 4294967280  ;;  %s7418_s30 = sld [smem:[#allocation43_spill]] }
 0x8d7   : > { %s7419_s29 = sld [smem:[#allocation40_spill]] }
 0x8d8   : > { %s7420_s2 = sld [smem:[#allocation41_spill]] }
 0x8d9   : > { %s7421_s6 = sld [smem:[#allocation44_spill]] }
 0x8dc   : > { %p44_p12 = scmp.ge.s32.totalorder %s7418_s30, 4  }
 0x8de   :  { %46 = sbr.rel (!%p44_p12) target bundleno = 28 (0x1c), region = 220 }
 0x8e3   :  { %4349 = vsyncpa [#allocation3], 1 }
 0x8e4   :  { %4351 = vsyncpa [#allocation3 + $0x1], 1 }
 0x8e5   :  { %4352 = vsyncpa [#allocation6], 1 }
 0x8e6   :  { %4353 = vsyncpa [#allocation9], 1 }
 0x8e7   :  { %4354 = vsyncpa [#allocation12], 1 }
 0x8e8   :  { %4355 = vsyncpa [#allocation15], 1 }
 0x8e9   :  { %4356 = vsyncpa [#allocation18], 1 }
 0x8ea   :  { %4357 = vsyncpa [#allocation21], 1 }
 0x8eb   :  { %4358 = vsyncpa [#allocation24], 1 }
 0x8ec   :  { %4359 = vsyncpa [#allocation27], 1 }
 0x8ed   :  { %4360 = vsyncpa [#allocation4], 1 }
 0x8ee   :  { %4362 = vsyncpa [#allocation4 + $0x1], 1 }

</bundles_post_ra>
